<compile_context>
chip_gen: v6e
topology: v6e:2x2x1
jax: 0.10.0
libtpu: 0.0.40
codegen_flags: <defaults>
</compile_context>

<pallas_src>
import functools
import math

import jax
import jax.numpy as jnp
from jax.experimental import pallas as pl
from jax.experimental.pallas import tpu as pltpu

_SQRT_HALF = math.sqrt(0.5)
_LANE = 128


def _round_up(v: int, m: int) -> int:
    return (v + m - 1) // m * m


def _pick_tiling(batch: int):
    """Pick (row_tile, padded_batch): >=2 tiles when possible (v7x megacore),
    tile capped at 512 rows, minimal padding for awkward batch sizes."""
    b8 = _round_up(batch, 8)
    n_tiles = max(-(-b8 // 512), 2 if b8 >= 16 else 1)
    tile = _round_up(-(-batch // n_tiles), 8)
    return tile, n_tiles * tile


def _decoder_kernel(x_ref, w0_ref, wrest_ref, wlin_ref, blin_ref, o_ref, *,
                    cp, num_layers, num_rest):
    """Whole TabNetDecoder forward for one batch tile (all L transformers
    unrolled in-body, weights VMEM-resident)."""
    x = x_ref[...]
    w_dtype = wrest_ref.dtype

    def glu(z):
        # GLU halves live at [0:cp] / [cp:2cp]; sigmoid goes to the EUP slot.
        return z[:, :cp] * jax.nn.sigmoid(z[:, cp:])

    def cast(h):
        # Residual/accumulator math stays f32; feed the MXU in the weights'
        # native dtype only when they are sub-f32 (bf16-native MXU).
        return h if w_dtype == jnp.float32 else h.astype(w_dtype)

    # Fused first GLU layer of all L transformers: one wide matmul (shared LHS).
    z0 = jnp.dot(x, w0_ref[...], preferred_element_type=jnp.float32)  # (tile, L*2cp)

    acc = None
    for l in range(num_layers):
        h = glu(z0[:, l * 2 * cp:(l + 1) * 2 * cp])
        for j in range(num_rest):
            z = jnp.dot(cast(h), wrest_ref[l, j],
                        preferred_element_type=jnp.float32)
            h = h * _SQRT_HALF + glu(z)
        acc = h if acc is None else acc + h

    out = jnp.dot(cast(acc), wlin_ref[...], preferred_element_type=jnp.float32)
    out = out + blin_ref[...].astype(jnp.float32)
    o_ref[...] = out.astype(o_ref.dtype)


def _pad_glu_weight(w, cin_p, cout, cp):
    """(2*cout, cin) PyTorch Linear layout -> (cin_p, 2*cp), pre-transposed,
    GLU halves placed at columns [0:cout] and [cp:cp+cout] (zero pad neutral)."""
    cin = w.shape[1]
    out = jnp.zeros((cin_p, 2 * cp), w.dtype)
    out = out.at[:cin, :cout].set(w[:cout].T)
    out = out.at[:cin, cp:cp + cout].set(w[cout:].T)
    return out


def pack_tabnet_decoder_params(glu_weights, lin_w, lin_b):
    """One-time weight repacking (run at model init / param load, NOT per call).

    glu_weights: list (len = num_layers) of lists [W0 (2*Cout, Cin), W1..Wk
                 (2*Cout, Cout)] — shared + dependent GLU layers in order.
    lin_w:       (Cout, Cout) final Linear weight (PyTorch layout)
    lin_b:       (Cout,)      final Linear bias
    """
    L = len(glu_weights)
    cin = glu_weights[0][0].shape[1]
    cout = lin_w.shape[0]
    num_rest = len(glu_weights[0]) - 1
    cin_p = _round_up(cin, _LANE)
    cp = _round_up(cout, _LANE)

    # Fused first-layer weights for all L transformers: (cin_p, L*2cp).
    w0_all = jnp.concatenate(
        [_pad_glu_weight(ws[0], cin_p, cout, cp) for ws in glu_weights], axis=1)
    if num_rest > 0:
        w_rest = jnp.stack([
            jnp.stack([_pad_glu_weight(ws[j + 1], cp, cout, cp)
                       for j in range(num_rest)])
            for ws in glu_weights])                           # (L, num_rest, cp, 2cp)
    else:
        w_rest = jnp.zeros((L, 1, cp, 2 * cp), lin_w.dtype)   # unused placeholder
    w_lin_p = jnp.zeros((cp, cp), lin_w.dtype).at[:cout, :cout].set(lin_w.T)
    b_lin_p = jnp.zeros((1, cp), lin_b.dtype).at[0, :cout].set(lin_b)

    meta = dict(num_layers=L, num_rest=num_rest, cin=cin, cout=cout,
                cin_p=cin_p, cp=cp)
    return (w0_all, w_rest, w_lin_p, b_lin_p), meta


def tabnet_decoder_apply(x, packed, meta):
    """Forward pass with pre-packed parameters (jit-able)."""
    w0_all, w_rest, w_lin_p, b_lin_p = packed
    B, cin = x.shape
    cin_p, cp = meta["cin_p"], meta["cp"]
    L, num_rest = meta["num_layers"], meta["num_rest"]
    num_rest_b = max(num_rest, 1)
    cout = meta["cout"]

    tile, b_p = _pick_tiling(B)
    x_p = jnp.zeros((b_p, cin_p), x.dtype).at[:B, :cin].set(x)

    kernel = functools.partial(_decoder_kernel, cp=cp, num_layers=L,
                               num_rest=num_rest)

    out_p = pl.pallas_call(
        kernel,
        out_shape=jax.ShapeDtypeStruct((b_p, cp), x.dtype),
        grid=(b_p // tile,),
        in_specs=[
            pl.BlockSpec((tile, cin_p), lambda i: (i, 0)),            # x tile
            pl.BlockSpec((cin_p, L * 2 * cp), lambda i: (0, 0)),      # fused first-layer weights (resident)
            pl.BlockSpec((L, num_rest_b, cp, 2 * cp),
                         lambda i: (0, 0, 0, 0)),                     # remaining GLU weights (resident)
            pl.BlockSpec((cp, cp), lambda i: (0, 0)),                 # final linear W^T (resident)
            pl.BlockSpec((1, cp), lambda i: (0, 0)),                  # final linear bias
        ],
        out_specs=pl.BlockSpec((tile, cp), lambda i: (i, 0)),
        compiler_params=pltpu.CompilerParams(
            dimension_semantics=("parallel",)),
    )(x_p, w0_all, w_rest, w_lin_p, b_lin_p)

    return out_p[:B, :cout]


def tabnet_decoder(x, glu_weights, lin_w, lin_b):
    """Convenience wrapper: pack + apply in one call."""
    packed, meta = pack_tabnet_decoder_params(glu_weights, lin_w, lin_b)
    return tabnet_decoder_apply(x, packed, meta)


def _reference(x, glu_weights, lin_w, lin_b):
    """Pure-JAX mirror of TabNetDecoder.forward (default GLU layer counts)."""
    x = x.astype(jnp.float32)
    cout = lin_w.shape[0]

    def glu_layer(h, w):
        z = h @ w.T.astype(jnp.float32)
        return z[:, :cout] * jax.nn.sigmoid(z[:, cout:])

    outs = []
    for ws in glu_weights:
        h = glu_layer(x, ws[0])                       # no_first_residual
        for w in ws[1:]:
            h = h * _SQRT_HALF + glu_layer(h, w)
        outs.append(h)
    out = sum(outs)
    return out @ lin_w.T.astype(jnp.float32) + lin_b.astype(jnp.float32)


if __name__ == "__main__":
    B, CIN, COUT, NUM_LAYERS = 16, 32, 16, 2
    NUM_SHARED, NUM_DEPENDENT = 2, 2          # module defaults
    glu_per_transformer = NUM_SHARED + NUM_DEPENDENT

    key = jax.random.PRNGKey(0)
    key, kx = jax.random.split(key)
    x = jax.random.normal(kx, (B, CIN), dtype=jnp.float32)

    # torch.nn.Linear.reset_parameters -> U(-1/sqrt(fan_in), 1/sqrt(fan_in))
    glu_weights = []
    for _ in range(NUM_LAYERS):               # the (L+1)-th transformer is unused in forward()
        ws = []
        for j in range(glu_per_transformer):
            fan_in = CIN if j == 0 else COUT
            bound = 1.0 / math.sqrt(fan_in)
            key, kw = jax.random.split(key)
            ws.append(jax.random.uniform(kw, (2 * COUT, fan_in), dtype=jnp.float32,
                                         minval=-bound, maxval=bound))
        glu_weights.append(ws)

    bound = 1.0 / math.sqrt(COUT)
    key, kw, kb = jax.random.split(key, 3)
    lin_w = jax.random.uniform(kw, (COUT, COUT), dtype=jnp.float32,
                               minval=-bound, maxval=bound)
    lin_b = jax.random.uniform(kb, (COUT,), dtype=jnp.float32,
                               minval=-bound, maxval=bound)

    # Pack weights once (hoisted out of the per-call path), jit the forward.
    packed, meta = pack_tabnet_decoder_params(glu_weights, lin_w, lin_b)
    fwd = jax.jit(lambda xx: tabnet_decoder_apply(xx, packed, meta))

    out = jax.block_until_ready(fwd(x))

    ref = _reference(x, glu_weights, lin_w, lin_b)
    assert out.shape == (B, COUT)
    assert bool(jnp.all(jnp.isfinite(out)))
    assert jnp.allclose(out, ref, atol=1e-4, rtol=1e-4), float(jnp.max(jnp.abs(out - ref)))

    print("KERNEL_OK")
</pallas_src>

<mosaic_0001>
module attributes {stable_mosaic.version = 11 : i64} {
  func.func @_decoder_kernel(%arg0: i32, %arg1: memref<8x128xf32, #tpu.memory_space<vmem>>, %arg2: memref<128x512xf32, #tpu.memory_space<vmem>>, %arg3: memref<2x3x128x256xf32, #tpu.memory_space<vmem>>, %arg4: memref<128x128xf32, #tpu.memory_space<vmem>>, %arg5: memref<1x128xf32, #tpu.memory_space<vmem>>, %arg6: memref<8x128xf32, #tpu.memory_space<vmem>>) attributes {dimension_semantics = [#tpu.dimension_semantics<parallel>], iteration_bounds = array<i64: 2>, scalar_prefetch = 0 : i64, scratch_operands = 0 : i64, tpu.core_type = #tpu.core_type<tc>, window_params = [{transform_indices = @transform_0, window_bounds = array<i64: 8, 128>}, {pipeline_mode = #tpu.pipeline_mode<synchronous>, transform_indices = @transform_1, window_bounds = array<i64: 128, 512>}, {pipeline_mode = #tpu.pipeline_mode<synchronous>, transform_indices = @transform_2, window_bounds = array<i64: 2, 3, 128, 256>}, {pipeline_mode = #tpu.pipeline_mode<synchronous>, transform_indices = @transform_3, window_bounds = array<i64: 128, 128>}, {pipeline_mode = #tpu.pipeline_mode<synchronous>, transform_indices = @transform_4, window_bounds = array<i64: 1, 128>}, {transform_indices = @transform_5, window_bounds = array<i64: 8, 128>}]} {
    %c0 = arith.constant 0 : index
    %c0_0 = arith.constant 0 : index
    %0 = vector.load %arg1[%c0, %c0_0] : memref<8x128xf32, #tpu.memory_space<vmem>>, vector<8x128xf32>
    %c0_1 = arith.constant 0 : index
    %c0_2 = arith.constant 0 : index
    %1 = vector.load %arg2[%c0_1, %c0_2] : memref<128x512xf32, #tpu.memory_space<vmem>>, vector<128x512xf32>
    %cst = arith.constant dense<0.000000e+00> : vector<8x512xf32>
    %2 = tpu.matmul %0, %1, %cst {dimension_numbers = #tpu.dot_dimension_numbers<[1], [0], [0], [1], [0, 0, 1, 1], [], []>} : vector<8x128xf32>, vector<128x512xf32>, vector<8x512xf32> -> vector<8x512xf32>
    %3 = vector.extract_strided_slice %2 {offsets = [0, 0], sizes = [8, 256], strides = [1, 1]} : vector<8x512xf32> to vector<8x256xf32>
    %4 = vector.extract_strided_slice %3 {offsets = [0, 0], sizes = [8, 128], strides = [1, 1]} : vector<8x256xf32> to vector<8x128xf32>
    %5 = vector.extract_strided_slice %3 {offsets = [0, 128], sizes = [8, 128], strides = [1, 1]} : vector<8x256xf32> to vector<8x128xf32>
    %6 = arith.negf %5 : vector<8x128xf32>
    %7 = math.exp %6 : vector<8x128xf32>
    %cst_3 = arith.constant 1.000000e+00 : f32
    %8 = vector.broadcast %cst_3 : f32 to vector<8x128xf32>
    %9 = arith.addf %8, %7 : vector<8x128xf32>
    %10 = arith.divf %8, %9 : vector<8x128xf32>
    %11 = arith.mulf %4, %10 : vector<8x128xf32>
    %c0_4 = arith.constant 0 : index
    %c0_5 = arith.constant 0 : index
    %c0_6 = arith.constant 0 : index
    %c0_7 = arith.constant 0 : index
    %12 = vector.load %arg3[%c0_4, %c0_5, %c0_6, %c0_7] : memref<2x3x128x256xf32, #tpu.memory_space<vmem>>, vector<1x1x128x256xf32>
    %13 = vector.shape_cast %12 : vector<1x1x128x256xf32> to vector<128x256xf32>
    %cst_8 = arith.constant dense<0.000000e+00> : vector<8x256xf32>
    %14 = tpu.matmul %11, %13, %cst_8 {dimension_numbers = #tpu.dot_dimension_numbers<[1], [0], [0], [1], [0, 0, 1, 1], [], []>} : vector<8x128xf32>, vector<128x256xf32>, vector<8x256xf32> -> vector<8x256xf32>
    %cst_9 = arith.constant 0.707106769 : f32
    %15 = vector.broadcast %cst_9 : f32 to vector<8x128xf32>
    %16 = arith.mulf %11, %15 : vector<8x128xf32>
    %17 = vector.extract_strided_slice %14 {offsets = [0, 0], sizes = [8, 128], strides = [1, 1]} : vector<8x256xf32> to vector<8x128xf32>
    %18 = vector.extract_strided_slice %14 {offsets = [0, 128], sizes = [8, 128], strides = [1, 1]} : vector<8x256xf32> to vector<8x128xf32>
    %19 = arith.negf %18 : vector<8x128xf32>
    %20 = math.exp %19 : vector<8x128xf32>
    %cst_10 = arith.constant 1.000000e+00 : f32
    %21 = vector.broadcast %cst_10 : f32 to vector<8x128xf32>
    %22 = arith.addf %21, %20 : vector<8x128xf32>
    %23 = arith.divf %21, %22 : vector<8x128xf32>
    %24 = arith.mulf %17, %23 : vector<8x128xf32>
    %25 = arith.addf %16, %24 : vector<8x128xf32>
    %c0_11 = arith.constant 0 : index
    %c1 = arith.constant 1 : index
    %c0_12 = arith.constant 0 : index
    %c0_13 = arith.constant 0 : index
    %26 = vector.load %arg3[%c0_11, %c1, %c0_12, %c0_13] : memref<2x3x128x256xf32, #tpu.memory_space<vmem>>, vector<1x1x128x256xf32>
    %27 = vector.shape_cast %26 : vector<1x1x128x256xf32> to vector<128x256xf32>
    %cst_14 = arith.constant dense<0.000000e+00> : vector<8x256xf32>
    %28 = tpu.matmul %25, %27, %cst_14 {dimension_numbers = #tpu.dot_dimension_numbers<[1], [0], [0], [1], [0, 0, 1, 1], [], []>} : vector<8x128xf32>, vector<128x256xf32>, vector<8x256xf32> -> vector<8x256xf32>
    %cst_15 = arith.constant 0.707106769 : f32
    %29 = vector.broadcast %cst_15 : f32 to vector<8x128xf32>
    %30 = arith.mulf %25, %29 : vector<8x128xf32>
    %31 = vector.extract_strided_slice %28 {offsets = [0, 0], sizes = [8, 128], strides = [1, 1]} : vector<8x256xf32> to vector<8x128xf32>
    %32 = vector.extract_strided_slice %28 {offsets = [0, 128], sizes = [8, 128], strides = [1, 1]} : vector<8x256xf32> to vector<8x128xf32>
    %33 = arith.negf %32 : vector<8x128xf32>
    %34 = math.exp %33 : vector<8x128xf32>
    %cst_16 = arith.constant 1.000000e+00 : f32
    %35 = vector.broadcast %cst_16 : f32 to vector<8x128xf32>
    %36 = arith.addf %35, %34 : vector<8x128xf32>
    %37 = arith.divf %35, %36 : vector<8x128xf32>
    %38 = arith.mulf %31, %37 : vector<8x128xf32>
    %39 = arith.addf %30, %38 : vector<8x128xf32>
    %c0_17 = arith.constant 0 : index
    %c2 = arith.constant 2 : index
    %c0_18 = arith.constant 0 : index
    %c0_19 = arith.constant 0 : index
    %40 = vector.load %arg3[%c0_17, %c2, %c0_18, %c0_19] : memref<2x3x128x256xf32, #tpu.memory_space<vmem>>, vector<1x1x128x256xf32>
    %41 = vector.shape_cast %40 : vector<1x1x128x256xf32> to vector<128x256xf32>
    %cst_20 = arith.constant dense<0.000000e+00> : vector<8x256xf32>
    %42 = tpu.matmul %39, %41, %cst_20 {dimension_numbers = #tpu.dot_dimension_numbers<[1], [0], [0], [1], [0, 0, 1, 1], [], []>} : vector<8x128xf32>, vector<128x256xf32>, vector<8x256xf32> -> vector<8x256xf32>
    %cst_21 = arith.constant 0.707106769 : f32
    %43 = vector.broadcast %cst_21 : f32 to vector<8x128xf32>
    %44 = arith.mulf %39, %43 : vector<8x128xf32>
    %45 = vector.extract_strided_slice %42 {offsets = [0, 0], sizes = [8, 128], strides = [1, 1]} : vector<8x256xf32> to vector<8x128xf32>
    %46 = vector.extract_strided_slice %42 {offsets = [0, 128], sizes = [8, 128], strides = [1, 1]} : vector<8x256xf32> to vector<8x128xf32>
    %47 = arith.negf %46 : vector<8x128xf32>
    %48 = math.exp %47 : vector<8x128xf32>
    %cst_22 = arith.constant 1.000000e+00 : f32
    %49 = vector.broadcast %cst_22 : f32 to vector<8x128xf32>
    %50 = arith.addf %49, %48 : vector<8x128xf32>
    %51 = arith.divf %49, %50 : vector<8x128xf32>
    %52 = arith.mulf %45, %51 : vector<8x128xf32>
    %53 = arith.addf %44, %52 : vector<8x128xf32>
    %54 = vector.extract_strided_slice %2 {offsets = [0, 256], sizes = [8, 256], strides = [1, 1]} : vector<8x512xf32> to vector<8x256xf32>
    %55 = vector.extract_strided_slice %54 {offsets = [0, 0], sizes = [8, 128], strides = [1, 1]} : vector<8x256xf32> to vector<8x128xf32>
    %56 = vector.extract_strided_slice %54 {offsets = [0, 128], sizes = [8, 128], strides = [1, 1]} : vector<8x256xf32> to vector<8x128xf32>
    %57 = arith.negf %56 : vector<8x128xf32>
    %58 = math.exp %57 : vector<8x128xf32>
    %cst_23 = arith.constant 1.000000e+00 : f32
    %59 = vector.broadcast %cst_23 : f32 to vector<8x128xf32>
    %60 = arith.addf %59, %58 : vector<8x128xf32>
    %61 = arith.divf %59, %60 : vector<8x128xf32>
    %62 = arith.mulf %55, %61 : vector<8x128xf32>
    %c1_24 = arith.constant 1 : index
    %c0_25 = arith.constant 0 : index
    %c0_26 = arith.constant 0 : index
    %c0_27 = arith.constant 0 : index
    %63 = vector.load %arg3[%c1_24, %c0_25, %c0_26, %c0_27] : memref<2x3x128x256xf32, #tpu.memory_space<vmem>>, vector<1x1x128x256xf32>
    %64 = vector.shape_cast %63 : vector<1x1x128x256xf32> to vector<128x256xf32>
    %cst_28 = arith.constant dense<0.000000e+00> : vector<8x256xf32>
    %65 = tpu.matmul %62, %64, %cst_28 {dimension_numbers = #tpu.dot_dimension_numbers<[1], [0], [0], [1], [0, 0, 1, 1], [], []>} : vector<8x128xf32>, vector<128x256xf32>, vector<8x256xf32> -> vector<8x256xf32>
    %cst_29 = arith.constant 0.707106769 : f32
    %66 = vector.broadcast %cst_29 : f32 to vector<8x128xf32>
    %67 = arith.mulf %62, %66 : vector<8x128xf32>
    %68 = vector.extract_strided_slice %65 {offsets = [0, 0], sizes = [8, 128], strides = [1, 1]} : vector<8x256xf32> to vector<8x128xf32>
    %69 = vector.extract_strided_slice %65 {offsets = [0, 128], sizes = [8, 128], strides = [1, 1]} : vector<8x256xf32> to vector<8x128xf32>
    %70 = arith.negf %69 : vector<8x128xf32>
    %71 = math.exp %70 : vector<8x128xf32>
    %cst_30 = arith.constant 1.000000e+00 : f32
    %72 = vector.broadcast %cst_30 : f32 to vector<8x128xf32>
    %73 = arith.addf %72, %71 : vector<8x128xf32>
    %74 = arith.divf %72, %73 : vector<8x128xf32>
    %75 = arith.mulf %68, %74 : vector<8x128xf32>
    %76 = arith.addf %67, %75 : vector<8x128xf32>
    %c1_31 = arith.constant 1 : index
    %c1_32 = arith.constant 1 : index
    %c0_33 = arith.constant 0 : index
    %c0_34 = arith.constant 0 : index
    %77 = vector.load %arg3[%c1_31, %c1_32, %c0_33, %c0_34] : memref<2x3x128x256xf32, #tpu.memory_space<vmem>>, vector<1x1x128x256xf32>
    %78 = vector.shape_cast %77 : vector<1x1x128x256xf32> to vector<128x256xf32>
    %cst_35 = arith.constant dense<0.000000e+00> : vector<8x256xf32>
    %79 = tpu.matmul %76, %78, %cst_35 {dimension_numbers = #tpu.dot_dimension_numbers<[1], [0], [0], [1], [0, 0, 1, 1], [], []>} : vector<8x128xf32>, vector<128x256xf32>, vector<8x256xf32> -> vector<8x256xf32>
    %cst_36 = arith.constant 0.707106769 : f32
    %80 = vector.broadcast %cst_36 : f32 to vector<8x128xf32>
    %81 = arith.mulf %76, %80 : vector<8x128xf32>
    %82 = vector.extract_strided_slice %79 {offsets = [0, 0], sizes = [8, 128], strides = [1, 1]} : vector<8x256xf32> to vector<8x128xf32>
    %83 = vector.extract_strided_slice %79 {offsets = [0, 128], sizes = [8, 128], strides = [1, 1]} : vector<8x256xf32> to vector<8x128xf32>
    %84 = arith.negf %83 : vector<8x128xf32>
    %85 = math.exp %84 : vector<8x128xf32>
    %cst_37 = arith.constant 1.000000e+00 : f32
    %86 = vector.broadcast %cst_37 : f32 to vector<8x128xf32>
    %87 = arith.addf %86, %85 : vector<8x128xf32>
    %88 = arith.divf %86, %87 : vector<8x128xf32>
    %89 = arith.mulf %82, %88 : vector<8x128xf32>
    %90 = arith.addf %81, %89 : vector<8x128xf32>
    %c1_38 = arith.constant 1 : index
    %c2_39 = arith.constant 2 : index
    %c0_40 = arith.constant 0 : index
    %c0_41 = arith.constant 0 : index
    %91 = vector.load %arg3[%c1_38, %c2_39, %c0_40, %c0_41] : memref<2x3x128x256xf32, #tpu.memory_space<vmem>>, vector<1x1x128x256xf32>
    %92 = vector.shape_cast %91 : vector<1x1x128x256xf32> to vector<128x256xf32>
    %cst_42 = arith.constant dense<0.000000e+00> : vector<8x256xf32>
    %93 = tpu.matmul %90, %92, %cst_42 {dimension_numbers = #tpu.dot_dimension_numbers<[1], [0], [0], [1], [0, 0, 1, 1], [], []>} : vector<8x128xf32>, vector<128x256xf32>, vector<8x256xf32> -> vector<8x256xf32>
    %cst_43 = arith.constant 0.707106769 : f32
    %94 = vector.broadcast %cst_43 : f32 to vector<8x128xf32>
    %95 = arith.mulf %90, %94 : vector<8x128xf32>
    %96 = vector.extract_strided_slice %93 {offsets = [0, 0], sizes = [8, 128], strides = [1, 1]} : vector<8x256xf32> to vector<8x128xf32>
    %97 = vector.extract_strided_slice %93 {offsets = [0, 128], sizes = [8, 128], strides = [1, 1]} : vector<8x256xf32> to vector<8x128xf32>
    %98 = arith.negf %97 : vector<8x128xf32>
    %99 = math.exp %98 : vector<8x128xf32>
    %cst_44 = arith.constant 1.000000e+00 : f32
    %100 = vector.broadcast %cst_44 : f32 to vector<8x128xf32>
    %101 = arith.addf %100, %99 : vector<8x128xf32>
    %102 = arith.divf %100, %101 : vector<8x128xf32>
    %103 = arith.mulf %96, %102 : vector<8x128xf32>
    %104 = arith.addf %95, %103 : vector<8x128xf32>
    %105 = arith.addf %53, %104 : vector<8x128xf32>
    %c0_45 = arith.constant 0 : index
    %c0_46 = arith.constant 0 : index
    %106 = vector.load %arg4[%c0_45, %c0_46] : memref<128x128xf32, #tpu.memory_space<vmem>>, vector<128x128xf32>
    %cst_47 = arith.constant dense<0.000000e+00> : vector<8x128xf32>
    %107 = tpu.matmul %105, %106, %cst_47 {dimension_numbers = #tpu.dot_dimension_numbers<[1], [0], [0], [1], [0, 0, 1, 1], [], []>} : vector<8x128xf32>, vector<128x128xf32>, vector<8x128xf32> -> vector<8x128xf32>
    %c0_48 = arith.constant 0 : index
    %c0_49 = arith.constant 0 : index
    %108 = vector.load %arg5[%c0_48, %c0_49] : memref<1x128xf32, #tpu.memory_space<vmem>>, vector<1x128xf32>
    %109 = vector.broadcast %108 : vector<1x128xf32> to vector<8x128xf32>
    %110 = arith.addf %107, %109 : vector<8x128xf32>
    %c0_50 = arith.constant 0 : index
    %c0_51 = arith.constant 0 : index
    %111 = vector.load %arg6[%c0_50, %c0_51] : memref<8x128xf32, #tpu.memory_space<vmem>>, vector<8x128xf32>
    tpu.vector_store %arg6[%c0_50, %c0_51], %110 {strides = array<i32>} : memref<8x128xf32, #tpu.memory_space<vmem>>, vector<8x128xf32>,
    return
  }
  func.func @transform_0(%arg0: i32) -> (i32, i32) {
    %c0_i32 = arith.constant 0 : i32
    %c0_i32_0 = arith.constant 0 : i32
    return %arg0, %c0_i32 : i32, i32
  }
  func.func @transform_1(%arg0: i32) -> (i32, i32) {
    %c0_i32 = arith.constant 0 : i32
    %c0_i32_0 = arith.constant 0 : i32
    %c0_i32_1 = arith.constant 0 : i32
    return %c0_i32, %c0_i32_0 : i32, i32
  }
  func.func @transform_2(%arg0: i32) -> (i32, i32, i32, i32) {
    %c0_i32 = arith.constant 0 : i32
    %c0_i32_0 = arith.constant 0 : i32
    %c0_i32_1 = arith.constant 0 : i32
    %c0_i32_2 = arith.constant 0 : i32
    %c0_i32_3 = arith.constant 0 : i32
    return %c0_i32, %c0_i32_0, %c0_i32_1, %c0_i32_2 : i32, i32, i32, i32
  }
  func.func @transform_3(%arg0: i32) -> (i32, i32) {
    %c0_i32 = arith.constant 0 : i32
    %c0_i32_0 = arith.constant 0 : i32
    %c0_i32_1 = arith.constant 0 : i32
    return %c0_i32, %c0_i32_0 : i32, i32
  }
  func.func @transform_4(%arg0: i32) -> (i32, i32) {
    %c0_i32 = arith.constant 0 : i32
    %c0_i32_0 = arith.constant 0 : i32
    %c0_i32_1 = arith.constant 0 : i32
    return %c0_i32, %c0_i32_0 : i32, i32
  }
  func.func @transform_5(%arg0: i32) -> (i32, i32) {
    %c0_i32 = arith.constant 0 : i32
    %c0_i32_0 = arith.constant 0 : i32
    return %arg0, %c0_i32 : i32, i32
  }
}

</mosaic_0001>

<bundles_post_ra>
// kernel: _lambda_.1
= control target key start
LH: loop header
LB: loop body
LE: loop exit
PB: predicated region body
PF: predicated region fallthrough
CT: control target
= control target key end

     0   :  { %10 = vsyncpa [#allocation3], 0  ;;  %s1941_s0 = inlined_call_operand.vmem [shape: f32[16,128], index: 0, kind: input, shape index: {}]   ;;  %s1942_s1 = inlined_call_operand.hbm [shape: f32[128,512], index: 1, kind: input, shape index: {}]   ;;  %s1943_s2 = inlined_call_operand.hbm [shape: f32[2,3,128,256], index: 2, kind: input, shape index: {}]   ;;  %s1944_s3 = inlined_call_operand.hbm [shape: f32[128,128], index: 3, kind: input, shape index: {}]   ;;  %s1945_s4 = inlined_call_operand.vmem [shape: f32[1,128], index: 4, kind: input, shape index: {}]   ;;  %s1946_s5 = inlined_call_operand.hbm [shape: f32[16,128], index: 5, kind: output, shape index: {}]  }
   0x1   :  { %11 = vsyncpa [#allocation6], 0 }
   0x2   :  { %12 = vsyncpa [#allocation4], 0 }
   0x3   :  { %14 = vsyncpa [#allocation4 + $0x1], 0  ;;  %s1738_s18 = smov 0   ;;  %s1740_s19 = smov 0  }
   0x4   :  { %s1742_s20 = smov 0   ;;  %s1744_s21 = smov 0  }
   0x5 LB: > { %s1759_s22 = sadd.s32 4294967295, %s1694_s21   ;;  %s1361_s23 = sadd.s32 4294967294, %s1694_s21   ;;  %s1694_s21 = sphi %s1744_s21, %s1960_s21   ;;  %s1690_s20 = sphi %s1742_s20, %s1959_s20   ;;  %s1686_s19 = sphi %s1740_s19, %s1958_s19   ;;  %s1682_s18 = sphi %s1738_s18, %s1957_s18  }
   0x6   : > { %s1763_s24 = sadd.s32 1, %s1694_s21   ;;  %s137_s25 = sadd.s32 1, %s1690_s20 }
   0x7   : > { %s134_s26 = ssub.s32 %s1694_s21, %s1763_s24  ;;  %p147_p0 = scmp.ne.s32.totalorder %s1690_s20, %s1686_s19 }
   0x8   : > { %p135_p1 = scmp.eq.s32.totalorder %s134_s26, 0  ;;  %p148_p2 = scmp.eq.s32.totalorder %s1759_s22, 1 }
   0x9   : > { %p153_p3 = scmp.ne.s32.totalorder %s1686_s19, %s1682_s18  ;;  %p154_p4 = scmp.eq.s32.totalorder %s1361_s23, 1 }
   0xa   : > { %s1774_s27 = scalar_select %p135_p1, %s1690_s20, %s137_s25  }
   0xb   : > { %p1776_p5 = por %p148_p2, %p147_p0  ;;  %p1780_p6 = por %p154_p4, %p153_p3 }
   0xc   : > { %p1362_p7 = scmp.ge.s32.totalorder %s1694_s21, 1  ;;  %p161_p8 = scmp.lt.s32.totalorder %s1694_s21, 3 }
   0xd   : > { %s1949_s29 = scalar_select %p1780_p6, 1, 0 }
   0xe   : > { %p1947_p9 = scmp.eq.s32.totalorder %s1759_s22, 0  ;;  %p1787_p10 = pnand %p1362_p7, %p161_p8 }
   0xf   : > { %s1696_s6 = smov [#allocation5]   ;;  %s1697_s9 = smov [#allocation2]  }
  0x10   : > { %s186_s7 = sshll.u32 %s1696_s6, 4  ;;  %p1452_p11 = pneg %p1787_p10  ;;  %s187_s7 = int_to_ptr.vmem [resolvable:$true] %s186_s7 }
  0x11   : > { %s173_s10 = sshll.u32 %s1697_s9, 4  ;;  %s1559_s11 = scalar_lea.vmem %s187_s7, 24576  ;;  %s174_s10 = int_to_ptr.vmem [resolvable:$true] %s173_s10 }
  0x12   : > { %p1795_p12 = pnand %p1947_p9, %p1452_p11  ;;  %p1560_p0 = scmp.ne.s32.totalorder %s187_s7, %s1559_s11 }
  0x13   : > { %p1567_p3 = scmp.lt.s32.totalorder %s187_s7, %s187_s7  ;;  %p1568_p4 = scmp.lt.s32.totalorder %s1559_s11, %s1559_s11 }
  0x14   : > { %p1550_p13 = pneg %p1795_p12 }
  0x15   : > { %p1569_p7 = por %p1568_p4, %p1567_p3 }
  0x16   : > { %p1562_p1 = pnand %p1560_p0, %p1550_p13 }
  0x18   : > { %p1563_p2 = pneg %p1562_p1 }
  0x1a   : > { %p1570_p8 = pnand %p1569_p7, %p1563_p2 }
  0x1c   : > { %1573 = shalt.err (!%p1570_p8)
}
  0x1d   : > { %s1698_s12 = smov 256   ;;  %s1699_s13 = smov 16  }
  0x1e   : > { %1458 = dma.hbm_to_vmem [thread:$0]  (!%p1795_p12), %s1943_s2, 24576, %s187_s7, [#allocation6], %s1698_s12, %s1698_s12, %s1699_s13  }
  0x1f   : > { %s1585_s16 = scalar_lea.vmem %s174_s10, 8192  ;;  %p1593_p9 = scmp.lt.s32.totalorder %s174_s10, %s174_s10 }
  0x20   : > { %p1586_p11 = scmp.ne.s32.totalorder %s174_s10, %s1585_s16  ;;  %p1594_p6 = scmp.lt.s32.totalorder %s1585_s16, %s1585_s16 }
  0x22   : > { %p1588_p0 = pnand %p1586_p11, %p1550_p13  ;;  %p1595_p3 = por %p1594_p6, %p1593_p9 }
  0x24   : > { %p1589_p1 = pneg %p1588_p0 }
  0x26   : > { %p1596_p2 = pnand %p1595_p3, %p1589_p1 }
  0x28   : > { %1599 = shalt.err (!%p1596_p2)
}
  0x29   : > { %s1700_s17 = smov 512   ;;  %s1701_s23 = smov 32  }
  0x2a   : > { %1455 = dma.hbm_to_vmem [thread:$0]  (!%p1795_p12), %s1942_s1, 8192, %s174_s10, [#allocation3], %s1700_s17, %s1700_s17, %s1701_s23  }
  0x2b   : > { %s1702_s6 = smov [#allocation7]  }
  0x2c   : > { %s199_s7 = sshll.u32 %s1702_s6, 4  ;;  %s200_s7 = int_to_ptr.vmem [resolvable:$true] %s199_s7 }
  0x2d   : > { %s1611_s9 = scalar_lea.vmem %s200_s7, 2048  ;;  %p1619_p9 = scmp.lt.s32.totalorder %s200_s7, %s200_s7 }
  0x2e   : > { %p1612_p4 = scmp.ne.s32.totalorder %s200_s7, %s1611_s9  ;;  %p1620_p8 = scmp.lt.s32.totalorder %s1611_s9, %s1611_s9 }
  0x30   : > { %p1614_p7 = pnand %p1612_p4, %p1550_p13  ;;  %p1621_p11 = por %p1620_p8, %p1619_p9 }
  0x32   : > { %p1615_p6 = pneg %p1614_p7 }
  0x34   : > { %p1622_p0 = pnand %p1621_p11, %p1615_p6 }
  0x36   : > { %1625 = shalt.err (!%p1622_p0)
}
  0x37   : > { %s1703_s11 = smov 128   ;;  %s1704_s12 = smov 8  }
  0x38   : > { %1461 = dma.hbm_to_vmem [thread:$0]  (!%p1795_p12), %s1944_s3, 2048, %s200_s7, [#allocation6], %s1703_s11, %s1703_s11, %s1704_s12  }
  0x39   : > { %225 = sbr.rel (%p1787_p10) target bundleno = 1495 (0x5d7), region = 40  ;;  %p1952_p1 = scmp.eq.s32.totalorder (!%p1787_p10), %s1759_s22, 0 }
  0x3e   : > { %1669 = dma.done.wait (%p1952_p1), [#allocation3], 8192   ;;  %p1953_p13 = pmov %p1952_p1 }
  0x3f   : > { %p1954_p3 = pmov %p1952_p1 }
  0x40   : > { %1671 = vsyncadd (%p1953_p13), [#allocation3], 4294959104 }
  0x41   : > { %1673 = dma.done.wait (%p1954_p3), [#allocation6], 26624   ;;  %p1955_p2 = pmov %p1952_p1 }
  0x42   : > { %v1705_v0 = vmov 0.0   ;;  %v326_v1 = vld [vmem:[#allocation2 + $0x1e8] sm:$0xff]  ;;  %v325_v2 = vld [vmem:[#allocation2 + $0x1e0] sm:$0xff]  ;;  %p260_p10 = scmp.lt.s32.totalorder %s1759_s22, 1  ;;  %v328_v34 = vld [vmem:[#allocation2 + $0x1f8] sm:$0xff]  ;;  %vm1706_vm0 = vmmov 0  }
  0x43   : > { %1675 = vsyncadd (%p1955_p2), [#allocation6], 4294940672  ;;  %393 = vmatprep.mubr.f32.mxu0 %v1705_v0  ;;  %464 = vmatprep.mubr.f32.mxu1 %v1705_v0  ;;  %v322_v3 = vld [vmem:[#allocation2 + $0x1c8] sm:$0xff]  ;;  %v321_v4 = vld [vmem:[#allocation2 + $0x1c0] sm:$0xff]  ;;  %s257_s17 = sand.u32 1, %s1686_s19   ;;  %s1383_s6 = sshll.u32 %s1759_s22, 7 }
  0x44   : > { %329 = vmatprep.subr.mxu0 %v326_v1  ;;  %v318_v5 = vld [vmem:[#allocation2 + $0x1a8] sm:$0xff]  ;;  %v317_v6 = vld [vmem:[#allocation2 + $0x1a0] sm:$0xff]  ;;  %s261_s30 = scalar_select %p260_p10, %s1759_s22, 1  ;;  %400 = vmatprep.subr.mxu1 %v328_v34  ;;  %v327_v35 = vld [vmem:[#allocation2 + $0x1f0] sm:$0xff] }
  0x45   : > { %330 = vmatpush1.msra.mxu0 %v325_v2  ;;  %v314_v7 = vld [vmem:[#allocation2 + $0x188] sm:$0xff]  ;;  %v313_v8 = vld [vmem:[#allocation2 + $0x180] sm:$0xff]  ;;  %v509_v36 = vld [vmem:[#allocation5 + $0xf8] sm:$0xff]  ;;  %401 = vmatpush1.msra.mxu1 %v327_v35  ;;  %s1371_s23 = sshll.u32 %s257_s17, 3  ;;  %s1906_s13 = scalar_lea.hbm %s1946_s5, %s1383_s6 }
  0x46   : > { %331 = vmatprep.subr.mxu0 %v322_v3  ;;  %v310_v9 = vld [vmem:[#allocation2 + $0x168] sm:$0xff]  ;;  %v309_v10 = vld [vmem:[#allocation2 + $0x160] sm:$0xff]  ;;  %s1372_s8 = sshll.u32 %s261_s30, 3  ;;  %v324_v37 = vld [vmem:[#allocation2 + $0x1d8] sm:$0xff]  ;;  %s259_s7 = scalar_lea.vmem [#allocation8], %s1371_s23 }
  0x47   : > { %332 = vmatpush1.msra.mxu0 %v321_v4  ;;  %v306_v11 = vld [vmem:[#allocation2 + $0x148] sm:$0xff]  ;;  %v305_v12 = vld [vmem:[#allocation2 + $0x140] sm:$0xff]  ;;  %s263_s16 = scalar_lea.vmem %s1941_s0, %s1372_s8  ;;  %v508_v38 = vld [vmem:[#allocation5 + $0xf0] sm:$0xff]  ;;  %402 = vmatprep.subr.mxu1 %v324_v37  ;;  %s1271_s9 = sshll.u32 %s259_s7, 4  ;;  %s1272_s9 = int_to_ptr.vmem [resolvable:$true] %s1271_s9 }
  0x48   : > { %333 = vmatprep.subr.mxu0 %v318_v5  ;;  %v302_v13 = vld [vmem:[#allocation2 + $0x128] sm:$0xff]  ;;  %v301_v14 = vld [vmem:[#allocation2 + $0x120] sm:$0xff]  ;;  %v323_v39 = vld [vmem:[#allocation2 + $0x1d0] sm:$0xff]  ;;  %s1258_s10 = scalar_lea.sflag [#allocation4], %s257_s17  ;;  %s1626_s30 = scalar_lea.vmem %s1272_s9, 128 }
  0x49   : > { %334 = vmatpush1.msra.mxu0 %v317_v6  ;;  %v298_v15 = vld [vmem:[#allocation2 + $0x108] sm:$0xff]  ;;  %v297_v16 = vld [vmem:[#allocation2 + $0x100] sm:$0xff]  ;;  %403 = vmatpush1.msra.mxu1 %v323_v39  ;;  %v320_v41 = vld [vmem:[#allocation2 + $0x1b8] sm:$0xff]  ;;  %p1627_p12 = scmp.ne.s32.totalorder %s1272_s9, %s1626_s30  ;;  %s1707_s8 = smov [#allocation8]  }
  0x4a   : > { %335 = vmatprep.subr.mxu0 %v314_v7  ;;  %v294_v17 = vld [vmem:[#allocation2 + $0xe8] sm:$0xff]  ;;  %v293_v18 = vld [vmem:[#allocation2 + $0xe0] sm:$0xff]  ;;  %404 = vmatprep.subr.mxu1 %v320_v41  ;;  %v319_v43 = vld [vmem:[#allocation2 + $0x1b0] sm:$0xff]  ;;  %s1630_s22 = sshll.u32 %s1707_s8, 4  ;;  %s1631_s22 = int_to_ptr.vmem [resolvable:$false] %s1630_s22 }
  0x4b   : > { %336 = vmatpush1.msra.mxu0 %v313_v8  ;;  %v290_v19 = vld [vmem:[#allocation2 + $0xc8] sm:$0xff]  ;;  %v289_v20 = vld [vmem:[#allocation2 + $0xc0] sm:$0xff]  ;;  %v505_v44 = vld [vmem:[#allocation5 + $0xd8] sm:$0xff]  ;;  %405 = vmatpush1.msra.mxu1 %v319_v43  ;;  %p1628_p4 = pnand %p1627_p12, %p1776_p5  ;;  %s1632_s14 = scalar_lea.vmem %s1631_s22, 256 }
  0x4c   : > { %337 = vmatprep.subr.mxu0 %v310_v9  ;;  %v286_v21 = vld [vmem:[#allocation2 + $0xa8] sm:$0xff]  ;;  %v285_v22 = vld [vmem:[#allocation2 + $0xa0] sm:$0xff]  ;;  %v316_v45 = vld [vmem:[#allocation2 + $0x198] sm:$0xff]  ;;  %p1633_p6 = scmp.lt.s32.totalorder %s1272_s9, %s1631_s22  ;;  %p1634_p9 = scmp.lt.s32.totalorder %s1632_s14, %s1626_s30 }
  0x4d   : > { %338 = vmatpush1.msra.mxu0 %v309_v10  ;;  %v282_v23 = vld [vmem:[#allocation2 + $0x88] sm:$0xff]  ;;  %v281_v24 = vld [vmem:[#allocation2 + $0x80] sm:$0xff]  ;;  %v504_v46 = vld [vmem:[#allocation5 + $0xd0] sm:$0xff]  ;;  %406 = vmatprep.subr.mxu1 %v316_v45  ;;  %p1629_p7 = pneg %p1628_p4 }
  0x4e   : > { %339 = vmatprep.subr.mxu0 %v306_v11  ;;  %v278_v25 = vld [vmem:[#allocation2 + $0x68] sm:$0xff]  ;;  %v277_v26 = vld [vmem:[#allocation2 + $0x60] sm:$0xff]  ;;  %v315_v47 = vld [vmem:[#allocation2 + $0x190] sm:$0xff]  ;;  %p1635_p8 = por %p1634_p9, %p1633_p6 }
  0x4f   : > { %340 = vmatpush1.msra.mxu0 %v305_v12  ;;  %v274_v27 = vld [vmem:[#allocation2 + $0x48] sm:$0xff]  ;;  %v273_v28 = vld [vmem:[#allocation2 + $0x40] sm:$0xff]  ;;  %407 = vmatpush1.msra.mxu1 %v315_v47  ;;  %v312_v49 = vld [vmem:[#allocation2 + $0x178] sm:$0xff] }
  0x50   : > { %341 = vmatprep.subr.mxu0 %v302_v13  ;;  %v270_v29 = vld [vmem:[#allocation2 + $0x28] sm:$0xff]  ;;  %v269_v30 = vld [vmem:[#allocation2 + $0x20] sm:$0xff]  ;;  %408 = vmatprep.subr.mxu1 %v312_v49  ;;  %v311_v51 = vld [vmem:[#allocation2 + $0x170] sm:$0xff]  ;;  %p1636_p11 = pnand %p1635_p8, %p1629_p7 }
  0x51   : > { %342 = vmatpush1.msra.mxu0 %v301_v14  ;;  %v266_v31 = vld [vmem:[#allocation2 + $0x8] sm:$0xff]  ;;  %v265_v32 = vld [vmem:[#allocation2] sm:$0xff]  ;;  %v501_v52 = vld [vmem:[#allocation5 + $0xb8] sm:$0xff]  ;;  %409 = vmatpush1.msra.mxu1 %v311_v51 }
  0x52   : > { %343 = vmatprep.subr.mxu0 %v298_v15  ;;  %v1842_v33 = vld [vmem:[%s263_s16] sm:$0xff]  ;;  %v507_v40 = vld [vmem:[#allocation5 + $0xe8] sm:$0xff]  ;;  %v308_v53 = vld [vmem:[#allocation2 + $0x158] sm:$0xff] }
  0x53   : > { %344 = vmatpush1.msra.mxu0 %v297_v16  ;;  %v506_v42 = vld [vmem:[#allocation5 + $0xe0] sm:$0xff]  ;;  %v503_v48 = vld [vmem:[#allocation5 + $0xc8] sm:$0xff]  ;;  %v500_v54 = vld [vmem:[#allocation5 + $0xb0] sm:$0xff]  ;;  %410 = vmatprep.subr.mxu1 %v308_v53 }
  0x54   : > { %345 = vmatprep.subr.mxu0 %v294_v17  ;;  %v502_v50 = vld [vmem:[#allocation5 + $0xc0] sm:$0xff]  ;;  %v307_v55 = vld [vmem:[#allocation2 + $0x150] sm:$0xff]  ;;  %v499_v56 = vld [vmem:[#allocation5 + $0xa8] sm:$0xff] }
  0x55   : > { %346 = vmatpush1.msra.mxu0 %v293_v18  ;;  %411 = vmatpush1.msra.mxu1 %v307_v55  ;;  %v304_v57 = vld [vmem:[#allocation2 + $0x138] sm:$0xff]  ;;  %v498_v58 = vld [vmem:[#allocation5 + $0xa0] sm:$0xff]  ;;  %v303_v59 = vld [vmem:[#allocation2 + $0x130] sm:$0xff] }
  0x56   : > { %347 = vmatprep.subr.mxu0 %v290_v19  ;;  %412 = vmatprep.subr.mxu1 %v304_v57  ;;  %v497_v60 = vld [vmem:[#allocation5 + $0x98] sm:$0xff]  ;;  %v496_v62 = vld [vmem:[#allocation5 + $0x90] sm:$0xff]  ;;  %v495_v1 = vld [vmem:[#allocation5 + $0x88] sm:$0xff] }
  0x57   : > { %348 = vmatpush1.msra.mxu0 %v289_v20  ;;  %413 = vmatpush1.msra.mxu1 %v303_v59  ;;  %v300_v61 = vld [vmem:[#allocation2 + $0x118] sm:$0xff]  ;;  %v299_v63 = vld [vmem:[#allocation2 + $0x110] sm:$0xff]  ;;  %v494_v3 = vld [vmem:[#allocation5 + $0x80] sm:$0xff] }
  0x58   : > { %349 = vmatprep.subr.mxu0 %v286_v21  ;;  %414 = vmatprep.subr.mxu1 %v300_v61  ;;  %v296_v2 = vld [vmem:[#allocation2 + $0xf8] sm:$0xff]  ;;  %v295_v4 = vld [vmem:[#allocation2 + $0xf0] sm:$0xff]  ;;  %v491_v9 = vld [vmem:[#allocation5 + $0x68] sm:$0xff] }
  0x59   : > { %350 = vmatpush1.msra.mxu0 %v285_v22  ;;  %415 = vmatpush1.msra.mxu1 %v299_v63  ;;  %v493_v5 = vld [vmem:[#allocation5 + $0x78] sm:$0xff]  ;;  %v492_v7 = vld [vmem:[#allocation5 + $0x70] sm:$0xff]  ;;  %v490_v11 = vld [vmem:[#allocation5 + $0x60] sm:$0xff] }
  0x5a   : > { %351 = vmatprep.subr.mxu0 %v282_v23  ;;  %416 = vmatprep.subr.mxu1 %v296_v2  ;;  %v292_v6 = vld [vmem:[#allocation2 + $0xd8] sm:$0xff]  ;;  %v291_v8 = vld [vmem:[#allocation2 + $0xd0] sm:$0xff]  ;;  %v487_v17 = vld [vmem:[#allocation5 + $0x48] sm:$0xff] }
  0x5b   : > { %352 = vmatpush1.msra.mxu0 %v281_v24  ;;  %417 = vmatpush1.msra.mxu1 %v295_v4  ;;  %v288_v10 = vld [vmem:[#allocation2 + $0xb8] sm:$0xff]  ;;  %v287_v12 = vld [vmem:[#allocation2 + $0xb0] sm:$0xff]  ;;  %v486_v19 = vld [vmem:[#allocation5 + $0x40] sm:$0xff] }
  0x5c   : > { %353 = vmatprep.subr.mxu0 %v278_v25  ;;  %418 = vmatprep.subr.mxu1 %v292_v6  ;;  %v489_v13 = vld [vmem:[#allocation5 + $0x58] sm:$0xff]  ;;  %v488_v15 = vld [vmem:[#allocation5 + $0x50] sm:$0xff]  ;;  %v483_v25 = vld [vmem:[#allocation5 + $0x28] sm:$0xff] }
  0x5d   : > { %354 = vmatpush1.msra.mxu0 %v277_v26  ;;  %419 = vmatpush1.msra.mxu1 %v291_v8  ;;  %v284_v14 = vld [vmem:[#allocation2 + $0x98] sm:$0xff]  ;;  %v283_v16 = vld [vmem:[#allocation2 + $0x90] sm:$0xff]  ;;  %v479_v34 = vld [vmem:[#allocation5 + $0x8] sm:$0xff] }
  0x5e   : > { %355 = vmatprep.subr.mxu0 %v274_v27  ;;  %420 = vmatprep.subr.mxu1 %v288_v10  ;;  %v280_v18 = vld [vmem:[#allocation2 + $0x78] sm:$0xff]  ;;  %v279_v20 = vld [vmem:[#allocation2 + $0x70] sm:$0xff]  ;;  %v482_v27 = vld [vmem:[#allocation5 + $0x20] sm:$0xff] }
  0x5f   : > { %356 = vmatpush1.msra.mxu0 %v273_v28  ;;  %421 = vmatpush1.msra.mxu1 %v287_v12  ;;  %v485_v21 = vld [vmem:[#allocation5 + $0x38] sm:$0xff]  ;;  %v484_v23 = vld [vmem:[#allocation5 + $0x30] sm:$0xff]  ;;  %v478_v35 = vld [vmem:[#allocation5] sm:$0xff] }
  0x60   : > { %357 = vmatprep.subr.mxu0 %v270_v29  ;;  %422 = vmatprep.subr.mxu1 %v284_v14  ;;  %v276_v22 = vld [vmem:[#allocation2 + $0x58] sm:$0xff]  ;;  %v275_v24 = vld [vmem:[#allocation2 + $0x50] sm:$0xff]  ;;  %v619_v45 = vld [vmem:[#allocation5 + $0x1e0] sm:$0xff] }
  0x61   : > { %358 = vmatpush1.msra.mxu0 %v269_v30  ;;  %423 = vmatpush1.msra.mxu1 %v283_v16  ;;  %v272_v26 = vld [vmem:[#allocation2 + $0x38] sm:$0xff]  ;;  %v271_v28 = vld [vmem:[#allocation2 + $0x30] sm:$0xff]  ;;  %v615_v49 = vld [vmem:[#allocation5 + $0x1c0] sm:$0xff] }
  0x62   : > { %359 = vmatprep.subr.mxu0 %v266_v31  ;;  %424 = vmatprep.subr.mxu1 %v280_v18  ;;  %v481_v29 = vld [vmem:[#allocation5 + $0x18] sm:$0xff]  ;;  %v480_v31 = vld [vmem:[#allocation5 + $0x10] sm:$0xff]  ;;  %v611_v53 = vld [vmem:[#allocation5 + $0x1a0] sm:$0xff] }
  0x63   : > { %360 = vmatpush1.msra.mxu0 %v265_v32  ;;  %425 = vmatpush1.msra.mxu1 %v279_v20  ;;  %v268_v30 = vld [vmem:[#allocation2 + $0x18] sm:$0xff]  ;;  %v267_v32 = vld [vmem:[#allocation2 + $0x10] sm:$0xff]  ;;  %v607_v57 = vld [vmem:[#allocation5 + $0x180] sm:$0xff] }
  0x64   : > { %394 = vmatmul.mubr.f32.vlgmr.msra.gmra.mxu0 %v1842_v33  ;;  %510 = vmatprep.subr.mxu0 %v509_v36  ;;  %v622_v43 = vld [vmem:[#allocation5 + $0x1f8] sm:$0xff]  ;;  %v617_v47 = vld [vmem:[#allocation5 + $0x1d0] sm:$0xff]  ;;  %v603_v61 = vld [vmem:[#allocation5 + $0x160] sm:$0xff] }
  0x65   : > { %574 = vmatprep.mubr.f32.mxu0 %v1705_v0  ;;  %511 = vmatpush1.msra.mxu0 %v508_v38  ;;  %v613_v51 = vld [vmem:[#allocation5 + $0x1b0] sm:$0xff]  ;;  %v599_v2 = vld [vmem:[#allocation5 + $0x140] sm:$0xff] }
  0x66   : > { %512 = vmatprep.subr.mxu0 %v507_v40  ;;  %426 = vmatprep.subr.mxu1 %v276_v22  ;;  %v609_v55 = vld [vmem:[#allocation5 + $0x190] sm:$0xff]  ;;  %v595_v6 = vld [vmem:[#allocation5 + $0x120] sm:$0xff] }
  0x67   : > { %513 = vmatpush1.msra.mxu0 %v506_v42  ;;  %427 = vmatpush1.msra.mxu1 %v275_v24  ;;  %v605_v59 = vld [vmem:[#allocation5 + $0x170] sm:$0xff]  ;;  %v591_v10 = vld [vmem:[#allocation5 + $0x100] sm:$0xff] }
  0x68   : > { %514 = vmatprep.subr.mxu0 %v505_v44  ;;  %428 = vmatprep.subr.mxu1 %v272_v26  ;;  %v620_v44 = vld [vmem:[#allocation5 + $0x1e8] sm:$0xff]  ;;  %v601_v63 = vld [vmem:[#allocation5 + $0x150] sm:$0xff]  ;;  %v852_v26 = vld [vmem:[#allocation5 + $0x3e0] sm:$0xff] }
  0x69   : > { %515 = vmatpush1.msra.mxu0 %v504_v46  ;;  %429 = vmatpush1.msra.mxu1 %v271_v28  ;;  %v618_v46 = vld [vmem:[#allocation5 + $0x1d8] sm:$0xff]  ;;  %v597_v4 = vld [vmem:[#allocation5 + $0x130] sm:$0xff] }
  0x6a   : > { %516 = vmatprep.subr.mxu0 %v503_v48  ;;  %430 = vmatprep.subr.mxu1 %v268_v30  ;;  %v616_v48 = vld [vmem:[#allocation5 + $0x1c8] sm:$0xff]  ;;  %v593_v8 = vld [vmem:[#allocation5 + $0x110] sm:$0xff]  ;;  %v848_v30 = vld [vmem:[#allocation5 + $0x3c0] sm:$0xff] }
  0x6b   : > { %517 = vmatpush1.msra.mxu0 %v502_v50  ;;  %431 = vmatpush1.msra.mxu1 %v267_v32  ;;  %v614_v50 = vld [vmem:[#allocation5 + $0x1b8] sm:$0xff]  ;;  %v854_v24 = vld [vmem:[#allocation5 + $0x3f0] sm:$0xff] }
  0x6c   : > { %518 = vmatprep.subr.mxu0 %v501_v52  ;;  %465 = vmatmul.mubr.f32.vlgmr.msra.gmra.mxu1 %v1842_v33  ;;  %v621_v33 = vld [vmem:[#allocation5 + $0x1f0] sm:$0xff]  ;;  %v612_v52 = vld [vmem:[#allocation5 + $0x1a8] sm:$0xff] }
  0x6d   : > { %519 = vmatpush1.msra.mxu0 %v500_v54  ;;  %687 = vmatprep.mubr.f32.mxu1 %v1705_v0  ;;  %v610_v54 = vld [vmem:[#allocation5 + $0x198] sm:$0xff]  ;;  %v850_v28 = vld [vmem:[#allocation5 + $0x3d0] sm:$0xff] }
  0x6e   : > { %520 = vmatprep.subr.mxu0 %v499_v56  ;;  %623 = vmatprep.subr.mxu1 %v622_v43  ;;  %v608_v56 = vld [vmem:[#allocation5 + $0x188] sm:$0xff]  ;;  %v846_v32 = vld [vmem:[#allocation5 + $0x3b0] sm:$0xff] }
  0x6f   : > { %521 = vmatpush1.msra.mxu0 %v498_v58  ;;  %624 = vmatpush1.msra.mxu1 %v621_v33  ;;  %v606_v58 = vld [vmem:[#allocation5 + $0x178] sm:$0xff]  ;;  %v838_v43 = vld [vmem:[#allocation5 + $0x370] sm:$0xff]  ;;  %v837_v33 = vld [vmem:[#allocation5 + $0x368] sm:$0xff] }
  0x70   : > { %522 = vmatprep.subr.mxu0 %v497_v60  ;;  %625 = vmatprep.subr.mxu1 %v620_v44  ;;  %v604_v60 = vld [vmem:[#allocation5 + $0x168] sm:$0xff]  ;;  %v836_v44 = vld [vmem:[#allocation5 + $0x360] sm:$0xff] }
  0x71   : > { %523 = vmatpush1.msra.mxu0 %v496_v62  ;;  %626 = vmatpush1.msra.mxu1 %v619_v45  ;;  %v602_v62 = vld [vmem:[#allocation5 + $0x158] sm:$0xff] }
  0x72   : > { %524 = vmatprep.subr.mxu0 %v495_v1  ;;  %627 = vmatprep.subr.mxu1 %v618_v46  ;;  %v600_v1 = vld [vmem:[#allocation5 + $0x148] sm:$0xff]  ;;  %v835_v45 = vld [vmem:[#allocation5 + $0x358] sm:$0xff]  ;;  %v834_v46 = vld [vmem:[#allocation5 + $0x350] sm:$0xff] }
  0x73   : > { %525 = vmatpush1.msra.mxu0 %v494_v3  ;;  %628 = vmatpush1.msra.mxu1 %v617_v47  ;;  %v598_v3 = vld [vmem:[#allocation5 + $0x138] sm:$0xff]  ;;  %v833_v47 = vld [vmem:[#allocation5 + $0x348] sm:$0xff] }
  0x74   : > { %526 = vmatprep.subr.mxu0 %v493_v5  ;;  %629 = vmatprep.subr.mxu1 %v616_v48  ;;  %v596_v5 = vld [vmem:[#allocation5 + $0x128] sm:$0xff]  ;;  %v832_v48 = vld [vmem:[#allocation5 + $0x340] sm:$0xff] }
  0x75   : > { %527 = vmatpush1.msra.mxu0 %v492_v7  ;;  %630 = vmatpush1.msra.mxu1 %v615_v49  ;;  %v594_v7 = vld [vmem:[#allocation5 + $0x118] sm:$0xff] }
  0x76   : > { %528 = vmatprep.subr.mxu0 %v491_v9  ;;  %631 = vmatprep.subr.mxu1 %v614_v50  ;;  %v592_v9 = vld [vmem:[#allocation5 + $0x108] sm:$0xff]  ;;  %v831_v49 = vld [vmem:[#allocation5 + $0x338] sm:$0xff]  ;;  %v830_v50 = vld [vmem:[#allocation5 + $0x330] sm:$0xff] }
  0x77   : > { %529 = vmatpush1.msra.mxu0 %v490_v11  ;;  %632 = vmatpush1.msra.mxu1 %v613_v51  ;;  %v855_v11 = vld [vmem:[#allocation5 + $0x3f8] sm:$0xff]  ;;  %v829_v51 = vld [vmem:[#allocation5 + $0x328] sm:$0xff] }
  0x78   : > { %530 = vmatprep.subr.mxu0 %v489_v13  ;;  %633 = vmatprep.subr.mxu1 %v612_v52  ;;  %v828_v52 = vld [vmem:[#allocation5 + $0x320] sm:$0xff] }
  0x79   : > { %531 = vmatpush1.msra.mxu0 %v488_v15  ;;  %634 = vmatpush1.msra.mxu1 %v611_v53  ;;  %v827_v53 = vld [vmem:[#allocation5 + $0x318] sm:$0xff] }
  0x7a   : > { %532 = vmatprep.subr.mxu0 %v487_v17  ;;  %635 = vmatprep.subr.mxu1 %v610_v54  ;;  %v826_v54 = vld [vmem:[#allocation5 + $0x310] sm:$0xff] }
  0x7b   : > { %533 = vmatpush1.msra.mxu0 %v486_v19  ;;  %636 = vmatpush1.msra.mxu1 %v609_v55 }
  0x7c   : > { %534 = vmatprep.subr.mxu0 %v485_v21  ;;  %637 = vmatprep.subr.mxu1 %v608_v56  ;;  %v825_v56 = vld [vmem:[#allocation5 + $0x308] sm:$0xff] }
  0x7d   : > { %535 = vmatpush1.msra.mxu0 %v484_v23  ;;  %638 = vmatpush1.msra.mxu1 %v607_v57  ;;  %v824_v57 = vld [vmem:[#allocation5 + $0x300] sm:$0xff] }
  0x7e   : > { %536 = vmatprep.subr.mxu0 %v483_v25  ;;  %639 = vmatprep.subr.mxu1 %v606_v58  ;;  %v853_v25 = vld [vmem:[#allocation5 + $0x3e8] sm:$0xff] }
  0x7f   : > { %537 = vmatpush1.msra.mxu0 %v482_v27  ;;  %640 = vmatpush1.msra.mxu1 %v605_v59  ;;  %v851_v27 = vld [vmem:[#allocation5 + $0x3d8] sm:$0xff] }
  0x80   : > { %538 = vmatprep.subr.mxu0 %v481_v29  ;;  %641 = vmatprep.subr.mxu1 %v604_v60  ;;  %v849_v29 = vld [vmem:[#allocation5 + $0x3c8] sm:$0xff]  ;;  %v735_v59 = vld [vmem:[#allocation5 + $0x2f8] sm:$0xff]  ;;  %v734_v60 = vld [vmem:[#allocation5 + $0x2f0] sm:$0xff] }
  0x81   : > { %539 = vmatpush1.msra.mxu0 %v480_v31  ;;  %642 = vmatpush1.msra.mxu1 %v603_v61  ;;  %v847_v31 = vld [vmem:[#allocation5 + $0x3b8] sm:$0xff]  ;;  %v733_v61 = vld [vmem:[#allocation5 + $0x2e8] sm:$0xff] }
  0x82   : > { %540 = vmatprep.subr.mxu0 %v479_v34  ;;  %643 = vmatprep.subr.mxu1 %v602_v62  ;;  %v732_v62 = vld [vmem:[#allocation5 + $0x2e0] sm:$0xff] }
  0x83   : > { %541 = vmatpush1.msra.mxu0 %v478_v35  ;;  %644 = vmatpush1.msra.mxu1 %v601_v63  ;;  %v845_v35 = vld [vmem:[#allocation5 + $0x3a8] sm:$0xff]  ;;  %v731_v63 = vld [vmem:[#allocation5 + $0x2d8] sm:$0xff] }
  0x84   : > { %645 = vmatprep.subr.mxu1 %v600_v1  ;;  %736 = vmatprep.subr.mxu0 %v735_v59  ;;  %v730_v1 = vld [vmem:[#allocation5 + $0x2d0] sm:$0xff]  ;;  %v952_v59 = vld [vmem:[#allocation5 + $0x478] sm:$0xff] }
  0x85   : > { %646 = vmatpush1.msra.mxu1 %v599_v2  ;;  %v729_v2 = vld [vmem:[#allocation5 + $0x2c8] sm:$0xff] }
  0x86   : > { %647 = vmatprep.subr.mxu1 %v598_v3  ;;  %v728_v3 = vld [vmem:[#allocation5 + $0x2c0] sm:$0xff] }
  0x87   : > { %648 = vmatpush1.msra.mxu1 %v597_v4  ;;  %v727_v4 = vld [vmem:[#allocation5 + $0x2b8] sm:$0xff] }
  0x88   : > { %649 = vmatprep.subr.mxu1 %v596_v5  ;;  %v726_v5 = vld [vmem:[#allocation5 + $0x2b0] sm:$0xff] }
  0x89   : > { %650 = vmatpush1.msra.mxu1 %v595_v6  ;;  %v725_v6 = vld [vmem:[#allocation5 + $0x2a8] sm:$0xff] }
  0x8a   : > { %651 = vmatprep.subr.mxu1 %v594_v7  ;;  %v724_v7 = vld [vmem:[#allocation5 + $0x2a0] sm:$0xff] }
  0x8b   : > { %652 = vmatpush1.msra.mxu1 %v593_v8  ;;  %v723_v8 = vld [vmem:[#allocation5 + $0x298] sm:$0xff] }
  0x8c   : > { %653 = vmatprep.subr.mxu1 %v592_v9  ;;  %v722_v9 = vld [vmem:[#allocation5 + $0x290] sm:$0xff] }
  0x8d   : > { %654 = vmatpush1.msra.mxu1 %v591_v10  ;;  %v721_v10 = vld [vmem:[#allocation5 + $0x288] sm:$0xff] }
  0x8e   : > { %856 = vmatprep.subr.mxu1 %v855_v11  ;;  %v720_v11 = vld [vmem:[#allocation5 + $0x280] sm:$0xff] }
 0x124   : > { %v395_v36 = vpop.f32.mrf.mxu0 }
 0x126   : > { %v397_v37 = vpop.f32.mrf.mxu0 }
 0x127   : > { %v1373_v38 = vmul.f32 -1.442695, %v397_v37  ;;  %v843_v37 = vld [vmem:[#allocation5 + $0x398] sm:$0xff] }
 0x129   : > { %1516 = vpow2.f32 %v1373_v38 }
 0x12c   : > { %v1852_v17 = vpop.f32.mrf.mxu1 }
 0x12e   : > { %v468_v18 = vpop.f32.mrf.mxu1 }
 0x12f   : > { %v1377_v19 = vmul.f32 -1.442695, %v468_v18  ;;  %v713_v18 = vld [vmem:[#allocation5 + $0x248] sm:$0xff] }
 0x136   : > { %v1517_v39 = vpop.eup %1516 }
 0x137   : > { %v474_v40 = vadd.f32 1.0, %v1517_v39  ;;  %v842_v39 = vld [vmem:[#allocation5 + $0x390] sm:$0xff] }
 0x139   : > { %1518 = vrcp.f32 %v474_v40  ;;  %v841_v40 = vld [vmem:[#allocation5 + $0x388] sm:$0xff] }
 0x146   : > { %v1519_v41 = vpop.eup %1518 }
 0x147   : > { %v1848_v42 = vmul.f32 %v1519_v41, %v395_v36  ;;  %v844_v36 = vld [vmem:[#allocation5 + $0x3a0] sm:$0xff] }
 0x148   : > { %v840_v41 = vld [vmem:[#allocation5 + $0x380] sm:$0xff] }
 0x149   : > { %575 = vmatmul.mubr.f32.vlgmr.msra.gmra.mxu0 %v1848_v42  ;;  %v581_v21 = vmul.f32 0.70710677, %v1848_v42  ;;  %v839_v42 = vld [vmem:[#allocation5 + $0x378] sm:$0xff] }
 0x14a   : > { %800 = vmatprep.mubr.f32.mxu0 %v1705_v0  ;;  %737 = vmatpush1.msra.mxu0 %v734_v60  ;;  %v951_v60 = vld [vmem:[#allocation5 + $0x470] sm:$0xff] }
 0x14b   : > { %738 = vmatprep.subr.mxu0 %v733_v61  ;;  %v950_v61 = vld [vmem:[#allocation5 + $0x468] sm:$0xff] }
 0x14c   : > { %739 = vmatpush1.msra.mxu0 %v732_v62  ;;  %v949_v62 = vld [vmem:[#allocation5 + $0x460] sm:$0xff] }
 0x14d   : > { %740 = vmatprep.subr.mxu0 %v731_v63  ;;  %v948_v63 = vld [vmem:[#allocation5 + $0x458] sm:$0xff] }
 0x14e   : > { %741 = vmatpush1.msra.mxu0 %v730_v1  ;;  %v947_v1 = vld [vmem:[#allocation5 + $0x450] sm:$0xff] }
 0x14f   : > { %742 = vmatprep.subr.mxu0 %v729_v2  ;;  %v946_v2 = vld [vmem:[#allocation5 + $0x448] sm:$0xff] }
 0x150   : > { %743 = vmatpush1.msra.mxu0 %v728_v3  ;;  %v945_v3 = vld [vmem:[#allocation5 + $0x440] sm:$0xff] }
 0x151   : > { %744 = vmatprep.subr.mxu0 %v727_v4  ;;  %v944_v4 = vld [vmem:[#allocation5 + $0x438] sm:$0xff] }
 0x152   : > { %745 = vmatpush1.msra.mxu0 %v726_v5  ;;  %v943_v5 = vld [vmem:[#allocation5 + $0x430] sm:$0xff] }
 0x153   : > { %746 = vmatprep.subr.mxu0 %v725_v6  ;;  %v942_v6 = vld [vmem:[#allocation5 + $0x428] sm:$0xff] }
 0x154   : > { %747 = vmatpush1.msra.mxu0 %v724_v7  ;;  %v941_v7 = vld [vmem:[#allocation5 + $0x420] sm:$0xff] }
 0x155   : > { %748 = vmatprep.subr.mxu0 %v723_v8  ;;  %v940_v8 = vld [vmem:[#allocation5 + $0x418] sm:$0xff] }
 0x156   : > { %749 = vmatpush1.msra.mxu0 %v722_v9  ;;  %v939_v9 = vld [vmem:[#allocation5 + $0x410] sm:$0xff] }
 0x157   : > { %750 = vmatprep.subr.mxu0 %v721_v10 }
 0x158   : > { %751 = vmatpush1.msra.mxu0 %v720_v11  ;;  %v938_v11 = vld [vmem:[#allocation5 + $0x408] sm:$0xff] }
 0x209   : > { %v576_v12 = vpop.f32.mrf.mxu0 }
 0x20b   : > { %v578_v13 = vpop.f32.mrf.mxu0 }
 0x20c   : > { %v1374_v14 = vmul.f32 -1.442695, %v578_v13  ;;  %v718_v13 = vld [vmem:[#allocation5 + $0x270] sm:$0xff] }
 0x20e   : > { %1520 = vpow2.f32 %v1374_v14  ;;  %v717_v14 = vld [vmem:[#allocation5 + $0x268] sm:$0xff] }
 0x21b   : > { %v1521_v15 = vpop.eup %1520 }
 0x21c   : > { %v585_v16 = vadd.f32 1.0, %v1521_v15  ;;  %v716_v15 = vld [vmem:[#allocation5 + $0x260] sm:$0xff] }
 0x21e   : > { %1522 = vrcp.f32 %v585_v16  ;;  %v715_v16 = vld [vmem:[#allocation5 + $0x258] sm:$0xff] }
 0x21f   : > { %1524 = vpow2.f32 %v1377_v19  ;;  %v712_v19 = vld [vmem:[#allocation5 + $0x240] sm:$0xff] }
 0x22b   : > { %v1523_v20 = vpop.eup %1522 }
 0x22c   : > { %v588_v22 = vmul.f32 %v1523_v20, %v576_v12  ;;  %v1525_v34 = vpop.eup %1524  ;;  %v719_v12 = vld [vmem:[#allocation5 + $0x278] sm:$0xff] }
 0x22d   : > { %v819_v38 = vadd.f32 1.0, %v1525_v34  ;;  %752 = vmatprep.subr.mxu0 %v719_v12  ;;  %v711_v20 = vld [vmem:[#allocation5 + $0x238] sm:$0xff]  ;;  %v937_v12 = vld [vmem:[#allocation5 + $0x400] sm:$0xff] }
 0x22e   : > { %v1855_v23 = vadd.f32 %v588_v22, %v581_v21  ;;  %753 = vmatpush1.msra.mxu0 %v718_v13  ;;  %v710_v21 = vld [vmem:[#allocation5 + $0x230] sm:$0xff]  ;;  %v709_v22 = vld [vmem:[#allocation5 + $0x228] sm:$0xff] }
 0x22f   : > { %1526 = vrcp.f32 %v819_v38  ;;  %754 = vmatprep.subr.mxu0 %v717_v14 }
 0x230   : > { %688 = vmatmul.mubr.f32.vlgmr.msra.gmra.mxu1 %v1855_v23  ;;  %755 = vmatpush1.msra.mxu0 %v716_v15 }
 0x231   : > { %857 = vmatpush1.msra.mxu1 %v854_v24  ;;  %920 = vmatprep.mubr.f32.mxu1 %v1705_v0  ;;  %v708_v24 = vld [vmem:[#allocation5 + $0x220] sm:$0xff] }
 0x232   : > { %858 = vmatprep.subr.mxu1 %v853_v25  ;;  %756 = vmatprep.subr.mxu0 %v715_v16  ;;  %v707_v25 = vld [vmem:[#allocation5 + $0x218] sm:$0xff] }
 0x233   : > { %859 = vmatpush1.msra.mxu1 %v852_v26  ;;  %v706_v26 = vld [vmem:[#allocation5 + $0x210] sm:$0xff]  ;;  %v1081_v16 = vld [vmem:[#allocation5 + $0x5f8] sm:$0xff] }
 0x234   : > { %860 = vmatprep.subr.mxu1 %v851_v27  ;;  %v705_v27 = vld [vmem:[#allocation5 + $0x208] sm:$0xff] }
 0x235   : > { %861 = vmatpush1.msra.mxu1 %v850_v28  ;;  %v704_v28 = vld [vmem:[#allocation5 + $0x200] sm:$0xff] }
 0x236   : > { %862 = vmatprep.subr.mxu1 %v849_v29  ;;  %v968_v29 = vld [vmem:[#allocation5 + $0x4f8] sm:$0xff] }
 0x237   : > { %863 = vmatpush1.msra.mxu1 %v848_v30 }
 0x238   : > { %864 = vmatprep.subr.mxu1 %v847_v31 }
 0x239   : > { %865 = vmatpush1.msra.mxu1 %v846_v32 }
 0x23a   : > { %866 = vmatprep.subr.mxu1 %v845_v35 }
 0x23b   : > { %867 = vmatpush1.msra.mxu1 %v844_v36 }
 0x23c   : > { %868 = vmatprep.subr.mxu1 %v843_v37  ;;  %v1527_v55 = vpop.eup %1526 }
 0x23d   : > { %869 = vmatpush1.msra.mxu1 %v842_v39  ;;  %v1860_v58 = vmul.f32 %v1527_v55, %v1852_v17  ;;  %v714_v17 = vld [vmem:[#allocation5 + $0x250] sm:$0xff]  ;;  %v954_v55 = vld [vmem:[#allocation5 + $0x488] sm:$0xff] }
 0x23e   : > { %870 = vmatprep.subr.mxu1 %v841_v40  ;;  %757 = vmatpush1.msra.mxu0 %v714_v17  ;;  %v694_v40 = vmul.f32 0.70710677, %v1855_v23  ;;  %v960_v23 = vld [vmem:[#allocation5 + $0x4b8] sm:$0xff]  ;;  %v1080_v17 = vld [vmem:[#allocation5 + $0x5f0] sm:$0xff] }
 0x23f   : > { %871 = vmatpush1.msra.mxu1 %v840_v41  ;;  %758 = vmatprep.subr.mxu0 %v713_v18  ;;  %v927_v13 = vmul.f32 0.70710677, %v1860_v58  ;;  %v1079_v18 = vld [vmem:[#allocation5 + $0x5e8] sm:$0xff] }
 0x240   : > { %872 = vmatprep.subr.mxu1 %v839_v42  ;;  %759 = vmatpush1.msra.mxu0 %v712_v19  ;;  %v1078_v19 = vld [vmem:[#allocation5 + $0x5e0] sm:$0xff] }
 0x241   : > { %873 = vmatpush1.msra.mxu1 %v838_v43  ;;  %760 = vmatprep.subr.mxu0 %v711_v20  ;;  %v967_v43 = vld [vmem:[#allocation5 + $0x4f0] sm:$0xff] }
 0x242   : > { %874 = vmatprep.subr.mxu1 %v837_v33  ;;  %761 = vmatpush1.msra.mxu0 %v710_v21  ;;  %v966_v33 = vld [vmem:[#allocation5 + $0x4e8] sm:$0xff]  ;;  %v1076_v20 = vld [vmem:[#allocation5 + $0x5d0] sm:$0xff] }
 0x243   : > { %875 = vmatpush1.msra.mxu1 %v836_v44  ;;  %762 = vmatprep.subr.mxu0 %v709_v22  ;;  %v965_v44 = vld [vmem:[#allocation5 + $0x4e0] sm:$0xff]  ;;  %v1075_v21 = vld [vmem:[#allocation5 + $0x5c8] sm:$0xff] }
 0x244   : > { %876 = vmatprep.subr.mxu1 %v835_v45  ;;  %763 = vmatpush1.msra.mxu0 %v708_v24  ;;  %v964_v45 = vld [vmem:[#allocation5 + $0x4d8] sm:$0xff]  ;;  %v1074_v22 = vld [vmem:[#allocation5 + $0x5c0] sm:$0xff] }
 0x245   : > { %877 = vmatpush1.msra.mxu1 %v834_v46  ;;  %764 = vmatprep.subr.mxu0 %v707_v25  ;;  %v963_v46 = vld [vmem:[#allocation5 + $0x4d0] sm:$0xff]  ;;  %v1073_v24 = vld [vmem:[#allocation5 + $0x5b8] sm:$0xff] }
 0x246   : > { %878 = vmatprep.subr.mxu1 %v833_v47  ;;  %765 = vmatpush1.msra.mxu0 %v706_v26  ;;  %v962_v47 = vld [vmem:[#allocation5 + $0x4c8] sm:$0xff]  ;;  %v1072_v25 = vld [vmem:[#allocation5 + $0x5b0] sm:$0xff] }
 0x247   : > { %879 = vmatpush1.msra.mxu1 %v832_v48  ;;  %766 = vmatprep.subr.mxu0 %v705_v27  ;;  %v961_v48 = vld [vmem:[#allocation5 + $0x4c0] sm:$0xff]  ;;  %v1071_v26 = vld [vmem:[#allocation5 + $0x5a8] sm:$0xff] }
 0x248   : > { %880 = vmatprep.subr.mxu1 %v831_v49  ;;  %767 = vmatpush1.msra.mxu0 %v704_v28  ;;  %v959_v49 = vld [vmem:[#allocation5 + $0x4b0] sm:$0xff]  ;;  %v1070_v27 = vld [vmem:[#allocation5 + $0x5a0] sm:$0xff]  ;;  %v1069_v28 = vld [vmem:[#allocation5 + $0x598] sm:$0xff] }
 0x249   : > { %881 = vmatpush1.msra.mxu1 %v830_v50  ;;  %969 = vmatprep.subr.mxu0 %v968_v29  ;;  %v958_v50 = vld [vmem:[#allocation5 + $0x4a8] sm:$0xff]  ;;  %v1068_v29 = vld [vmem:[#allocation5 + $0x590] sm:$0xff] }
 0x24a   : > { %882 = vmatprep.subr.mxu1 %v829_v51  ;;  %v957_v51 = vld [vmem:[#allocation5 + $0x4a0] sm:$0xff] }
 0x24b   : > { %883 = vmatpush1.msra.mxu1 %v828_v52  ;;  %v956_v52 = vld [vmem:[#allocation5 + $0x498] sm:$0xff] }
 0x24c   : > { %884 = vmatprep.subr.mxu1 %v827_v53  ;;  %v955_v53 = vld [vmem:[#allocation5 + $0x490] sm:$0xff] }
 0x24d   : > { %885 = vmatpush1.msra.mxu1 %v826_v54 }
 0x24e   : > { %886 = vmatprep.subr.mxu1 %v825_v56 }
 0x24f   : > { %887 = vmatpush1.msra.mxu1 %v824_v57  ;;  %v953_v57 = vld [vmem:[#allocation5 + $0x480] sm:$0xff] }
 0x250   : > { %921 = vmatmul.mubr.f32.vlgmr.msra.gmra.mxu1 %v1860_v58  ;;  %1082 = vmatprep.subr.mxu1 %v1081_v16  ;;  %v1077_v58 = vld [vmem:[#allocation5 + $0x5d8] sm:$0xff]  ;;  %v1165_v16 = vld [vmem:[#allocation7 + $0x10] sm:$0xff] }
 0x251   : > { %1146 = vmatprep.mubr.f32.mxu1 %v1705_v0  ;;  %1083 = vmatpush1.msra.mxu1 %v1080_v17  ;;  %v1164_v17 = vld [vmem:[#allocation7 + $0x8] sm:$0xff] }
 0x252   : > { %1084 = vmatprep.subr.mxu1 %v1079_v18  ;;  %v1163_v18 = vld [vmem:[#allocation7] sm:$0xff] }
 0x253   : > { %1085 = vmatpush1.msra.mxu1 %v1078_v19 }
 0x254   : > { %1086 = vmatprep.subr.mxu1 %v1077_v58 }
 0x255   : > { %1087 = vmatpush1.msra.mxu1 %v1076_v20 }
 0x256   : > { %1088 = vmatprep.subr.mxu1 %v1075_v21 }
 0x257   : > { %1089 = vmatpush1.msra.mxu1 %v1074_v22 }
 0x258   : > { %1090 = vmatprep.subr.mxu1 %v1073_v24 }
 0x259   : > { %1091 = vmatpush1.msra.mxu1 %v1072_v25 }
 0x25a   : > { %1092 = vmatprep.subr.mxu1 %v1071_v26 }
 0x25b   : > { %1093 = vmatpush1.msra.mxu1 %v1070_v27 }
 0x25c   : > { %1094 = vmatprep.subr.mxu1 %v1069_v28 }
 0x25d   : > { %1095 = vmatpush1.msra.mxu1 %v1068_v29 }
 0x2f0   : > { %v689_v30 = vpop.f32.mrf.mxu1 }
 0x2f2   : > { %v691_v31 = vpop.f32.mrf.mxu1 }
 0x2f3   : > { %v1375_v32 = vmul.f32 -1.442695, %v691_v31  ;;  %v1066_v31 = vld [vmem:[#allocation5 + $0x580] sm:$0xff] }
 0x2f5   : > { %1528 = vpow2.f32 %v1375_v32  ;;  %v1065_v32 = vld [vmem:[#allocation5 + $0x578] sm:$0xff] }
 0x302   : > { %v1529_v34 = vpop.eup %1528 }
 0x303   : > { %v698_v35 = vadd.f32 1.0, %v1529_v34  ;;  %v1064_v34 = vld [vmem:[#allocation5 + $0x570] sm:$0xff] }
 0x305   : > { %1530 = vrcp.f32 %v698_v35  ;;  %v1063_v35 = vld [vmem:[#allocation5 + $0x568] sm:$0xff] }
 0x310   : > { %v1864_v36 = vpop.f32.mrf.mxu1 }
 0x312   : > { %v1531_v37 = vpop.eup %1530  ;;  %v924_v38 = vpop.f32.mrf.mxu1 }
 0x313   : > { %v1378_v39 = vmul.f32 -1.442695, %v924_v38  ;;  %v701_v41 = vmul.f32 %v1531_v37, %v689_v30  ;;  %v1067_v30 = vld [vmem:[#allocation5 + $0x588] sm:$0xff]  ;;  %v1061_v37 = vld [vmem:[#allocation5 + $0x558] sm:$0xff]  ;;  %v1060_v38 = vld [vmem:[#allocation5 + $0x550] sm:$0xff] }
 0x314   : > { %1096 = vmatprep.subr.mxu1 %v1067_v30 }
 0x315   : > { %1532 = vpow2.f32 %v1378_v39  ;;  %v1867_v42 = vadd.f32 %v701_v41, %v694_v40  ;;  %1097 = vmatpush1.msra.mxu1 %v1066_v31  ;;  %v1059_v39 = vld [vmem:[#allocation5 + $0x548] sm:$0xff]  ;;  %v1058_v40 = vld [vmem:[#allocation5 + $0x540] sm:$0xff]  ;;  %v1057_v41 = vld [vmem:[#allocation5 + $0x538] sm:$0xff] }
 0x316   : > { %1098 = vmatprep.subr.mxu1 %v1065_v32 }
 0x317   : > { %801 = vmatmul.mubr.f32.vlgmr.msra.gmra.mxu0 %v1867_v42  ;;  %1099 = vmatpush1.msra.mxu1 %v1064_v34 }
 0x318   : > { %970 = vmatpush1.msra.mxu0 %v967_v43  ;;  %1033 = vmatprep.mubr.f32.mxu0 %v1705_v0  ;;  %v1056_v43 = vld [vmem:[#allocation5 + $0x530] sm:$0xff] }
 0x319   : > { %971 = vmatprep.subr.mxu0 %v966_v33  ;;  %1100 = vmatprep.subr.mxu1 %v1063_v35  ;;  %v1055_v33 = vld [vmem:[#allocation5 + $0x528] sm:$0xff] }
 0x31a   : > { %972 = vmatpush1.msra.mxu0 %v965_v44  ;;  %v1054_v44 = vld [vmem:[#allocation5 + $0x520] sm:$0xff] }
 0x31b   : > { %973 = vmatprep.subr.mxu0 %v964_v45  ;;  %v1053_v45 = vld [vmem:[#allocation5 + $0x518] sm:$0xff] }
 0x31c   : > { %974 = vmatpush1.msra.mxu0 %v963_v46  ;;  %v1052_v46 = vld [vmem:[#allocation5 + $0x510] sm:$0xff] }
 0x31d   : > { %975 = vmatprep.subr.mxu0 %v962_v47  ;;  %v1051_v47 = vld [vmem:[#allocation5 + $0x508] sm:$0xff] }
 0x31e   : > { %976 = vmatpush1.msra.mxu0 %v961_v48  ;;  %v1050_v48 = vld [vmem:[#allocation5 + $0x500] sm:$0xff] }
 0x31f   : > { %977 = vmatprep.subr.mxu0 %v960_v23 }
 0x320   : > { %978 = vmatpush1.msra.mxu0 %v959_v49 }
 0x321   : > { %979 = vmatprep.subr.mxu0 %v958_v50 }
 0x322   : > { %v1533_v54 = vpop.eup %1532  ;;  %980 = vmatpush1.msra.mxu0 %v957_v51 }
 0x323   : > { %v931_v56 = vadd.f32 1.0, %v1533_v54  ;;  %981 = vmatprep.subr.mxu0 %v956_v52 }
 0x324   : > { %982 = vmatpush1.msra.mxu0 %v955_v53 }
 0x325   : > { %1534 = vrcp.f32 %v931_v56  ;;  %983 = vmatprep.subr.mxu0 %v954_v55  ;;  %v807_v56 = vmul.f32 0.70710677, %v1867_v42  ;;  %v1176_v42 = vld [vmem:[#allocation7 + $0x68] sm:$0xff] }
 0x326   : > { %984 = vmatpush1.msra.mxu0 %v953_v57 }
 0x327   : > { %985 = vmatprep.subr.mxu0 %v952_v59 }
 0x328   : > { %986 = vmatpush1.msra.mxu0 %v951_v60 }
 0x329   : > { %987 = vmatprep.subr.mxu0 %v950_v61 }
 0x32a   : > { %988 = vmatpush1.msra.mxu0 %v949_v62 }
 0x32b   : > { %989 = vmatprep.subr.mxu0 %v948_v63 }
 0x32c   : > { %990 = vmatpush1.msra.mxu0 %v947_v1 }
 0x32d   : > { %991 = vmatprep.subr.mxu0 %v946_v2 }
 0x32e   : > { %992 = vmatpush1.msra.mxu0 %v945_v3 }
 0x32f   : > { %993 = vmatprep.subr.mxu0 %v944_v4  ;;  %v1178_v4 = vld [vmem:[#allocation7 + $0x78] sm:$0xff] }
 0x330   : > { %994 = vmatpush1.msra.mxu0 %v943_v5  ;;  %v1177_v5 = vld [vmem:[#allocation7 + $0x70] sm:$0xff] }
 0x331   : > { %995 = vmatprep.subr.mxu0 %v942_v6  ;;  %v1175_v6 = vld [vmem:[#allocation7 + $0x60] sm:$0xff] }
 0x332   : > { %v1535_v10 = vpop.eup %1534  ;;  %996 = vmatpush1.msra.mxu0 %v941_v7  ;;  %v1174_v7 = vld [vmem:[#allocation7 + $0x58] sm:$0xff] }
 0x333   : > { %997 = vmatprep.subr.mxu0 %v940_v8  ;;  %v934_v14 = vmul.f32 %v1535_v10, %v1864_v36  ;;  %v1062_v36 = vld [vmem:[#allocation5 + $0x560] sm:$0xff]  ;;  %v1173_v8 = vld [vmem:[#allocation7 + $0x50] sm:$0xff] }
 0x334   : > { %998 = vmatpush1.msra.mxu0 %v939_v9  ;;  %1101 = vmatpush1.msra.mxu1 %v1062_v36  ;;  %v1172_v9 = vld [vmem:[#allocation7 + $0x48] sm:$0xff]  ;;  %v1171_v10 = vld [vmem:[#allocation7 + $0x40] sm:$0xff] }
 0x335   : > { %999 = vmatprep.subr.mxu0 %v938_v11  ;;  %v1873_v15 = vadd.f32 %v934_v14, %v927_v13  ;;  %1102 = vmatprep.subr.mxu1 %v1061_v37  ;;  %v1170_v11 = vld [vmem:[#allocation7 + $0x38] sm:$0xff]  ;;  %v1168_v13 = vld [vmem:[#allocation7 + $0x28] sm:$0xff]  ;;  %v1167_v14 = vld [vmem:[#allocation7 + $0x20] sm:$0xff] }
 0x336   : > { %1000 = vmatpush1.msra.mxu0 %v937_v12  ;;  %1103 = vmatpush1.msra.mxu1 %v1060_v38  ;;  %v1169_v12 = vld [vmem:[#allocation7 + $0x30] sm:$0xff] }
 0x337   : > { %1034 = vmatmul.mubr.f32.vlgmr.msra.gmra.mxu0 %v1873_v15  ;;  %1403 = vmatprep.subr.mxu0 %v1705_v0  ;;  %v1040_v1 = vmul.f32 0.70710677, %v1873_v15  ;;  %v1166_v15 = vld [vmem:[#allocation7 + $0x18] sm:$0xff] }
 0x338   : > { %1104 = vmatprep.subr.mxu1 %v1059_v39  ;;  %1404 = vmatpush3.msra.mxu0 %v1178_v4 }
 0x339   : > { %1105 = vmatpush1.msra.mxu1 %v1058_v40  ;;  %1405 = vmatprep.subr.mxu0 %v1705_v0 }
 0x33a   : > { %1106 = vmatprep.subr.mxu1 %v1057_v41  ;;  %1406 = vmatpush3.msra.mxu0 %v1177_v5 }
 0x33b   : > { %1107 = vmatpush1.msra.mxu1 %v1056_v43  ;;  %1407 = vmatprep.subr.mxu0 %v1705_v0 }
 0x33c   : > { %1108 = vmatprep.subr.mxu1 %v1055_v33  ;;  %1408 = vmatpush3.msra.mxu0 %v1176_v42 }
 0x33d   : > { %1109 = vmatpush1.msra.mxu1 %v1054_v44  ;;  %1409 = vmatprep.subr.mxu0 %v1705_v0 }
 0x33e   : > { %1110 = vmatprep.subr.mxu1 %v1053_v45  ;;  %1410 = vmatpush3.msra.mxu0 %v1175_v6 }
 0x33f   : > { %1111 = vmatpush1.msra.mxu1 %v1052_v46  ;;  %1411 = vmatprep.subr.mxu0 %v1705_v0 }
 0x340   : > { %1112 = vmatprep.subr.mxu1 %v1051_v47  ;;  %1412 = vmatpush3.msra.mxu0 %v1174_v7 }
 0x341   : > { %1113 = vmatpush1.msra.mxu1 %v1050_v48  ;;  %1413 = vmatprep.subr.mxu0 %v1705_v0 }
 0x342   : > { %1414 = vmatpush3.msra.mxu0 %v1173_v8  ;;  %1435 = vmatprep.mubr.msk.f32.mxu0 %vm1706_vm0, %v1705_v0 }
 0x343   : > { %1415 = vmatprep.subr.mxu0 %v1705_v0 }
 0x344   : > { %1416 = vmatpush3.msra.mxu0 %v1172_v9 }
 0x345   : > { %1417 = vmatprep.subr.mxu0 %v1705_v0 }
 0x346   : > { %1418 = vmatpush3.msra.mxu0 %v1171_v10 }
 0x347   : > { %1419 = vmatprep.subr.mxu0 %v1705_v0 }
 0x348   : > { %1420 = vmatpush3.msra.mxu0 %v1170_v11 }
 0x349   : > { %1421 = vmatprep.subr.mxu0 %v1705_v0 }
 0x34a   : > { %1422 = vmatpush3.msra.mxu0 %v1169_v12 }
 0x34b   : > { %1423 = vmatprep.subr.mxu0 %v1705_v0 }
 0x34c   : > { %1424 = vmatpush3.msra.mxu0 %v1168_v13 }
 0x34d   : > { %1425 = vmatprep.subr.mxu0 %v1705_v0 }
 0x34e   : > { %1426 = vmatpush3.msra.mxu0 %v1167_v14 }
 0x34f   : > { %1427 = vmatprep.subr.mxu0 %v1705_v0 }
 0x350   : > { %1428 = vmatpush3.msra.mxu0 %v1166_v15 }
 0x351   : > { %1429 = vmatprep.subr.mxu0 %v1705_v0 }
 0x352   : > { %1430 = vmatpush3.msra.mxu0 %v1165_v16 }
 0x353   : > { %1431 = vmatprep.subr.mxu0 %v1705_v0 }
 0x354   : > { %1432 = vmatpush3.msra.mxu0 %v1164_v17 }
 0x355   : > { %1433 = vmatprep.subr.mxu0 %v1705_v0  ;;  %v1381_v0 = vld [vmem:[%s1945_s4] ss:$0 sm:$0xff] }
 0x356   : > { %1434 = vmatpush3.msra.mxu0 %v1163_v18 }
 0x3d7   : > { %v802_v23 = vpop.f32.mrf.mxu0 }
 0x3d9   : > { %v804_v49 = vpop.f32.mrf.mxu0 }
 0x3da   : > { %v1376_v50 = vmul.f32 -1.442695, %v804_v49 }
 0x3dc   : > { %1536 = vpow2.f32 %v1376_v50 }
 0x3e9   : > { %v1537_v51 = vpop.eup %1536 }
 0x3ea   : > { %v811_v52 = vadd.f32 1.0, %v1537_v51 }
 0x3ec   : > { %1538 = vrcp.f32 %v811_v52 }
 0x3f7   : > { %v1035_v53 = vpop.f32.mrf.mxu0 }
 0x3f9   : > { %v1539_v54 = vpop.eup %1538  ;;  %v1037_v55 = vpop.f32.mrf.mxu0 }
 0x3fa   : > { %v1379_v57 = vmul.f32 -1.442695, %v1037_v55  ;;  %v814_v59 = vmul.f32 %v1539_v54, %v802_v23 }
 0x3fc   : > { %1540 = vpow2.f32 %v1379_v57  ;;  %v1878_v60 = vadd.f32 %v814_v59, %v807_v56 }
 0x409   : > { %v1541_v61 = vpop.eup %1540 }
 0x40a   : > { %v1044_v62 = vadd.f32 1.0, %v1541_v61 }
 0x40c   : > { %1542 = vrcp.f32 %v1044_v62 }
 0x419   : > { %v1543_v63 = vpop.eup %1542 }
 0x41a   : > { %v1047_v2 = vmul.f32 %v1543_v63, %v1035_v53 }
 0x41c   : > { %v1048_v3 = vadd.f32 %v1047_v2, %v1040_v1 }
 0x41e   : > { %1147 = vmatmul.mubr.f32.vlgmr.msra.gmra.mxu1 %v1048_v3  ;;  %v1153_v25 = vmul.f32 0.70710677, %v1048_v3 }
 0x4de   : > { %v1148_v19 = vpop.f32.mrf.mxu1 }
 0x4e0   : > { %v1150_v58 = vpop.f32.mrf.mxu1 }
 0x4e1   : > { %v1380_v20 = vmul.f32 -1.442695, %v1150_v58 }
 0x4e3   : > { %1544 = vpow2.f32 %v1380_v20 }
 0x4f0   : > { %v1545_v21 = vpop.eup %1544 }
 0x4f1   : > { %v1157_v22 = vadd.f32 1.0, %v1545_v21 }
 0x4f3   : > { %1546 = vrcp.f32 %v1157_v22 }
 0x500   : > { %v1547_v24 = vpop.eup %1546 }
 0x501   : > { %v1160_v26 = vmul.f32 %v1547_v24, %v1148_v19 }
 0x503   : > { %v1161_v27 = vadd.f32 %v1160_v26, %v1153_v25 }
 0x505   : > { %v1162_v28 = vadd.f32 %v1161_v27, %v1878_v60 }
 0x507   : > { %1436 = vmatmul.mubr.f32.vlgmr.msra.gmra.mxu0 %v1162_v28 }
 0x5c7   : > { %v1252_v29 = vpop.f32.mrf.mxu0 }
 0x5c8   : > { %v1253_v30 = vadd.f32 %v1381_v0, %v1252_v29 }
 0x5c9   : > { %v1437_v31 = vpop.f32.mrf.mxu0 }
 0x5ca   : > { %1256 = vst [vmem:[%s259_s7] sm:$0xff] %v1253_v30 }
 0x5cb   : > { %1639 = shalt.err (!%p1636_p11)
}
 0x5cc   : > { %s1640_s15 = scalar_lea.hbm %s1906_s13, 128  ;;  %s1644_s23 = scalar_lea.hbm %s1946_s5, 256 }
 0x5cd   : > { %p1641_p0 = scmp.ne.s32.totalorder %s1906_s13, %s1640_s15  ;;  %p1645_p3 = scmp.lt.s32.totalorder %s1906_s13, %s1946_s5 }
 0x5ce   : > { %p1646_p2 = scmp.lt.s32.totalorder %s1644_s23, %s1640_s15 }
 0x5cf   : > { %p1642_p1 = pnand %p1641_p0, %p1776_p5 }
 0x5d0   : > { %p1647_p10 = por %p1646_p2, %p1645_p3 }
 0x5d1   : > { %p1643_p13 = pneg %p1642_p1 }
 0x5d3   : > { %p1648_p12 = pnand %p1647_p10, %p1643_p13 }
 0x5d5   : > { %1651 = shalt.err (!%p1648_p12)
}
 0x5d6   : > { %1450 = dma.vmem_to_hbm [thread:$0]  (%p1776_p5), %s1272_s9, 128, %s1906_s13, %s1258_s10  }
 0x5d7 PF: > { %p1472_p4 = scmp.ge.s32.totalorder %s1694_s21, 2  ;;  %s1283_s6 = sand.u32 1, %s1682_s18  }
 0x5d8   : > { %p1956_p7 = scmp.ne.s32.totalorder %s1949_s29, 0  ;;  %s1284_s7 = scalar_lea.sflag [#allocation4], %s1283_s6 }
 0x5da   : > { %p1463_p6 = pnand %p1472_p4, %p1956_p7 }
 0x5dc   : > { %p1464_p9 = pneg %p1463_p6 }
 0x5de   : > { %1677 = dma.done.wait (%p1464_p9), %s1284_s7, 128  }
 0x5df   : > { %1679 = vsyncadd (%p1464_p9), %s1284_s7, 4294967168  ;;  %p17_p8 = scmp.ge.s32.totalorder %s1763_s24, 4   ;;  %s1957_s18 = smov %s1686_s19 }
 0x5e0   : > { %s1958_s19 = smov %s1690_s20  ;;  %s1959_s20 = smov %s1774_s27 }
 0x5e1   : > { %s1960_s21 = smov %s1763_s24  ;;  %19 = sbr.rel (!%p17_p8) target bundleno = 5 (0x5), region = 93 }
 0x5e6   :  { %1289 = vsyncpa [#allocation3], 1 }
 0x5e7   :  { %1291 = vsyncpa [#allocation3 + $0x1], 1 }
 0x5e8   :  { %1292 = vsyncpa [#allocation6], 1 }
 0x5e9   :  { %1293 = vsyncpa [#allocation4], 1 }
 0x5ea   :  { %1295 = vsyncpa [#allocation4 + $0x1], 1 }

</bundles_post_ra>
